<compile_context>
chip_gen: v6e
topology: v6e:2x2x1
jax: 0.10.0
libtpu: 0.0.40
codegen_flags: <defaults>
</compile_context>

<pallas_src>
import jax
import jax.numpy as jnp
from jax.experimental import pallas as pl
from jax.experimental.pallas import tpu as pltpu

IN_FEATURES = 3 * 28 * 28     # 2352
HIDDEN = 200
HIDDEN_PAD = 256              # MXU-friendly multiple of 128
LANE = 128
SUBLANE = 8


def _round_up(n, m):
    return (n + m - 1) // m * m


def mlp_kernel(x_ref, w1_ref, b1_ref, w2_ref, b2_ref, w3_ref, b3_ref, o_ref):
    """One batch tile of the fused 3-layer MLP.

    x:  (TB, 2352) f32 (cast to bf16 here)   w1: (2352, 256) bf16  b1: (1, 256) f32
                                             w2: (256, 256)  bf16  b2: (1, 256) f32
                                             w3: (256, CPAD) bf16  b3: (1, CPAD) f32
    o:  (TB, CPAD) bf16
    """
    # In-kernel bf16 cast: VPU work fully hidden under the x DMA, avoids a
    # separate XLA cast pass over the dominant HBM tensor.
    x = x_ref[...].astype(jnp.bfloat16)
    h1 = jnp.dot(x, w1_ref[...], preferred_element_type=jnp.float32) + b1_ref[...]
    h1 = jnp.maximum(h1, 0.0)                                    # relu (f32)
    h2 = jnp.dot(h1.astype(jnp.bfloat16), w2_ref[...],
                 preferred_element_type=jnp.float32) + b2_ref[...]
    h2 = jnp.maximum(h2, 0.0)                                    # relu (f32)
    out = jnp.dot(h2.astype(jnp.bfloat16), w3_ref[...],
                  preferred_element_type=jnp.float32) + b3_ref[...]
    o_ref[...] = out.astype(o_ref.dtype)


def prepare_params(params):
    """One-time param prep: pad hidden 200->256 and classes to a multiple of
    128, cast weights to bf16. Store the result as the canonical params so
    the forward pass never re-pads / re-casts weights through HBM."""
    w1, b1, w2, b2, w3, b3 = params            # weights stored (in, out)
    n_class = w3.shape[1]
    c_pad = _round_up(max(n_class, LANE), LANE)
    hp = HIDDEN_PAD - HIDDEN
    # Zero padding is exact: padded hidden columns are relu(0) = 0 and padded
    # weight rows are 0, so they never contribute to valid outputs.
    w1p = jnp.pad(w1, ((0, 0), (0, hp))).astype(jnp.bfloat16)
    b1p = jnp.pad(b1, ((0, 0), (0, hp))).astype(jnp.float32)
    w2p = jnp.pad(w2, ((0, hp), (0, hp))).astype(jnp.bfloat16)
    b2p = jnp.pad(b2, ((0, 0), (0, hp))).astype(jnp.float32)
    w3p = jnp.pad(w3, ((0, hp), (0, c_pad - n_class))).astype(jnp.bfloat16)
    b3p = jnp.pad(b3, ((0, 0), (0, c_pad - n_class))).astype(jnp.float32)
    return (w1p, b1p, w2p, b2p, w3p, b3p), n_class


def mlp_forward(x_nchw, prepped, n_class, *, tb_max=1024):
    """x_nchw: (B, 3, 28, 28) float32. Returns (B, n_class) float32."""
    w1p, b1p, w2p, b2p, w3p, b3p = prepped
    c_pad = w3p.shape[1]
    B = x_nchw.shape[0]

    # glue reshape, exactly like torch's x.reshape(-1, 3*28*28); metadata only.
    x2d = x_nchw.reshape(B, IN_FEATURES)

    # ---- batch tiling (no jnp.pad copy of x) ----
    # Keep the tile a multiple of 8 sublanes; aim for >= 2 grid steps so both
    # v7x TensorCores get work. The last (partial) tile is handled by Pallas.
    tb = min(tb_max, max(SUBLANE, _round_up(pl.cdiv(B, 2), SUBLANE)))
    grid = (pl.cdiv(B, tb),)

    flops = 2 * B * (IN_FEATURES * HIDDEN_PAD
                     + HIDDEN_PAD * HIDDEN_PAD
                     + HIDDEN_PAD * c_pad)
    bytes_accessed = (B * IN_FEATURES * 4                            # x (f32)
                      + (w1p.size + w2p.size + w3p.size) * 2         # weights (bf16)
                      + (b1p.size + b2p.size + b3p.size) * 4         # biases (f32)
                      + B * c_pad * 2)                               # output (bf16)

    out_pad = pl.pallas_call(
        mlp_kernel,
        out_shape=jax.ShapeDtypeStruct((B, c_pad), jnp.bfloat16),
        grid=grid,
        in_specs=[
            pl.BlockSpec((tb, IN_FEATURES), lambda i: (i, 0)),          # x tile
            pl.BlockSpec((IN_FEATURES, HIDDEN_PAD), lambda i: (0, 0)),  # w1 (resident)
            pl.BlockSpec((1, HIDDEN_PAD), lambda i: (0, 0)),            # b1
            pl.BlockSpec((HIDDEN_PAD, HIDDEN_PAD), lambda i: (0, 0)),   # w2
            pl.BlockSpec((1, HIDDEN_PAD), lambda i: (0, 0)),            # b2
            pl.BlockSpec((HIDDEN_PAD, c_pad), lambda i: (0, 0)),        # w3
            pl.BlockSpec((1, c_pad), lambda i: (0, 0)),                 # b3
        ],
        out_specs=pl.BlockSpec((tb, c_pad), lambda i: (i, 0)),
        compiler_params=pltpu.CompilerParams(
            dimension_semantics=("parallel",),
            # TB=1024 with f32 x (~2x9.2 MiB x buffers + ~3 MiB weights +
            # intermediates) needs more than v5e's 16 MiB default scoped VMEM;
            # 48 MiB fits comfortably under v7x's 64 MiB physical VMEM.
            vmem_limit_bytes=48 * 1024 * 1024),
        cost_estimate=pl.CostEstimate(
            flops=flops, transcendentals=0, bytes_accessed=bytes_accessed),
    )(x2d, w1p, b1p, w2p, b2p, w3p, b3p)

    return out_pad[:, :n_class].astype(jnp.float32)


def init_params(key, n_class):
    """Deterministic init (uniform in +-1/sqrt(fan_in), like torch Linear)."""
    def linear(k, fan_in, fan_out):
        kw, kb = jax.random.split(k)
        bound = 1.0 / jnp.sqrt(float(fan_in))
        w = jax.random.uniform(kw, (fan_in, fan_out), jnp.float32, -bound, bound)
        b = jax.random.uniform(kb, (1, fan_out), jnp.float32, -bound, bound)
        return w, b

    k1, k2, k3 = jax.random.split(key, 3)
    w1, b1 = linear(k1, IN_FEATURES, HIDDEN)
    w2, b2 = linear(k2, HIDDEN, HIDDEN)
    w3, b3 = linear(k3, HIDDEN, n_class)
    return (w1, b1, w2, b2, w3, b3)


if __name__ == "__main__":
    key = jax.random.PRNGKey(0)
    k_x, k_p = jax.random.split(key)

    n_class = 10
    batch = 2
    x = jax.random.normal(k_x, (batch, 3, 28, 28), dtype=jnp.float32)
    params = init_params(k_p, n_class)

    # one-time weight prep (pad + bf16 cast), reused across forward calls
    prepped, n_class = prepare_params(params)

    out = mlp_forward(x, prepped, n_class)
    jax.block_until_ready(out)

    # sanity check against a plain-JAX f32 reference (kernel uses bf16
    # weights/activations internally, hence the relaxed tolerance)
    w1, b1, w2, b2, w3, b3 = params
    xr = x.reshape(batch, IN_FEATURES)
    ref = jnp.maximum(xr @ w1 + b1, 0.0)
    ref = jnp.maximum(ref @ w2 + b2, 0.0)
    ref = ref @ w3 + b3

    assert out.shape == (batch, n_class)
    assert jnp.allclose(out, ref, atol=5e-2, rtol=5e-2), (
        f"max abs err {jnp.max(jnp.abs(out - ref))}")

    print("KERNEL_OK")
</pallas_src>

<mosaic_0001>
module attributes {stable_mosaic.version = 11 : i64} {
  func.func @mlp_kernel(%arg0: i32, %arg1: memref<8x2352xf32, #tpu.memory_space<vmem>>, %arg2: memref<2352x256xbf16, #tpu.memory_space<vmem>>, %arg3: memref<1x256xf32, #tpu.memory_space<vmem>>, %arg4: memref<256x256xbf16, #tpu.memory_space<vmem>>, %arg5: memref<1x256xf32, #tpu.memory_space<vmem>>, %arg6: memref<256x128xbf16, #tpu.memory_space<vmem>>, %arg7: memref<1x128xf32, #tpu.memory_space<vmem>>, %arg8: memref<8x128xbf16, #tpu.memory_space<vmem>>) attributes {dimension_semantics = [#tpu.dimension_semantics<parallel>], iteration_bounds = array<i64: 1>, scalar_prefetch = 0 : i64, scratch_operands = 0 : i64, tpu.core_type = #tpu.core_type<tc>, window_params = [{transform_indices = @transform_0, window_bounds = array<i64: 8, 2352>}, {pipeline_mode = #tpu.pipeline_mode<synchronous>, transform_indices = @transform_1, window_bounds = array<i64: 2352, 256>}, {pipeline_mode = #tpu.pipeline_mode<synchronous>, transform_indices = @transform_2, window_bounds = array<i64: 1, 256>}, {pipeline_mode = #tpu.pipeline_mode<synchronous>, transform_indices = @transform_3, window_bounds = array<i64: 256, 256>}, {pipeline_mode = #tpu.pipeline_mode<synchronous>, transform_indices = @transform_4, window_bounds = array<i64: 1, 256>}, {pipeline_mode = #tpu.pipeline_mode<synchronous>, transform_indices = @transform_5, window_bounds = array<i64: 256, 128>}, {pipeline_mode = #tpu.pipeline_mode<synchronous>, transform_indices = @transform_6, window_bounds = array<i64: 1, 128>}, {transform_indices = @transform_7, window_bounds = array<i64: 8, 128>}]} {
    %c0 = arith.constant 0 : index
    %c0_0 = arith.constant 0 : index
    %0 = vector.load %arg1[%c0, %c0_0] : memref<8x2352xf32, #tpu.memory_space<vmem>>, vector<8x2352xf32>
    %1 = arith.truncf %0 : vector<8x2352xf32> to vector<8x2352xbf16>
    %c0_1 = arith.constant 0 : index
    %c0_2 = arith.constant 0 : index
    %2 = vector.load %arg2[%c0_1, %c0_2] : memref<2352x256xbf16, #tpu.memory_space<vmem>>, vector<2352x256xbf16>
    %cst = arith.constant dense<0.000000e+00> : vector<8x256xf32>
    %3 = tpu.matmul %1, %2, %cst {dimension_numbers = #tpu.dot_dimension_numbers<[1], [0], [0], [1], [0, 0, 1, 1], [], []>} : vector<8x2352xbf16>, vector<2352x256xbf16>, vector<8x256xf32> -> vector<8x256xf32>
    %c0_3 = arith.constant 0 : index
    %c0_4 = arith.constant 0 : index
    %4 = vector.load %arg3[%c0_3, %c0_4] : memref<1x256xf32, #tpu.memory_space<vmem>>, vector<1x256xf32>
    %5 = vector.broadcast %4 : vector<1x256xf32> to vector<8x256xf32>
    %6 = arith.addf %3, %5 : vector<8x256xf32>
    %cst_5 = arith.constant 0.000000e+00 : f32
    %7 = vector.broadcast %cst_5 : f32 to vector<8x256xf32>
    %8 = arith.maximumf %6, %7 : vector<8x256xf32>
    %9 = arith.truncf %8 : vector<8x256xf32> to vector<8x256xbf16>
    %c0_6 = arith.constant 0 : index
    %c0_7 = arith.constant 0 : index
    %10 = vector.load %arg4[%c0_6, %c0_7] : memref<256x256xbf16, #tpu.memory_space<vmem>>, vector<256x256xbf16>
    %cst_8 = arith.constant dense<0.000000e+00> : vector<8x256xf32>
    %11 = tpu.matmul %9, %10, %cst_8 {dimension_numbers = #tpu.dot_dimension_numbers<[1], [0], [0], [1], [0, 0, 1, 1], [], []>} : vector<8x256xbf16>, vector<256x256xbf16>, vector<8x256xf32> -> vector<8x256xf32>
    %c0_9 = arith.constant 0 : index
    %c0_10 = arith.constant 0 : index
    %12 = vector.load %arg5[%c0_9, %c0_10] : memref<1x256xf32, #tpu.memory_space<vmem>>, vector<1x256xf32>
    %13 = vector.broadcast %12 : vector<1x256xf32> to vector<8x256xf32>
    %14 = arith.addf %11, %13 : vector<8x256xf32>
    %cst_11 = arith.constant 0.000000e+00 : f32
    %15 = vector.broadcast %cst_11 : f32 to vector<8x256xf32>
    %16 = arith.maximumf %14, %15 : vector<8x256xf32>
    %17 = arith.truncf %16 : vector<8x256xf32> to vector<8x256xbf16>
    %c0_12 = arith.constant 0 : index
    %c0_13 = arith.constant 0 : index
    %18 = vector.load %arg6[%c0_12, %c0_13] : memref<256x128xbf16, #tpu.memory_space<vmem>>, vector<256x128xbf16>
    %cst_14 = arith.constant dense<0.000000e+00> : vector<8x128xf32>
    %19 = tpu.matmul %17, %18, %cst_14 {dimension_numbers = #tpu.dot_dimension_numbers<[1], [0], [0], [1], [0, 0, 1, 1], [], []>} : vector<8x256xbf16>, vector<256x128xbf16>, vector<8x128xf32> -> vector<8x128xf32>
    %c0_15 = arith.constant 0 : index
    %c0_16 = arith.constant 0 : index
    %20 = vector.load %arg7[%c0_15, %c0_16] : memref<1x128xf32, #tpu.memory_space<vmem>>, vector<1x128xf32>
    %21 = vector.broadcast %20 : vector<1x128xf32> to vector<8x128xf32>
    %22 = arith.addf %19, %21 : vector<8x128xf32>
    %23 = arith.truncf %22 : vector<8x128xf32> to vector<8x128xbf16>
    %c0_17 = arith.constant 0 : index
    %c0_18 = arith.constant 0 : index
    %24 = vector.load %arg8[%c0_17, %c0_18] : memref<8x128xbf16, #tpu.memory_space<vmem>>, vector<8x128xbf16>
    tpu.vector_store %arg8[%c0_17, %c0_18], %23 {strides = array<i32>} : memref<8x128xbf16, #tpu.memory_space<vmem>>, vector<8x128xbf16>,
    return
  }
  func.func @transform_0(%arg0: i32) -> (i32, i32) {
    %c0_i32 = arith.constant 0 : i32
    %c0_i32_0 = arith.constant 0 : i32
    return %arg0, %c0_i32 : i32, i32
  }
  func.func @transform_1(%arg0: i32) -> (i32, i32) {
    %c0_i32 = arith.constant 0 : i32
    %c0_i32_0 = arith.constant 0 : i32
    %c0_i32_1 = arith.constant 0 : i32
    return %c0_i32, %c0_i32_0 : i32, i32
  }
  func.func @transform_2(%arg0: i32) -> (i32, i32) {
    %c0_i32 = arith.constant 0 : i32
    %c0_i32_0 = arith.constant 0 : i32
    %c0_i32_1 = arith.constant 0 : i32
    return %c0_i32, %c0_i32_0 : i32, i32
  }
  func.func @transform_3(%arg0: i32) -> (i32, i32) {
    %c0_i32 = arith.constant 0 : i32
    %c0_i32_0 = arith.constant 0 : i32
    %c0_i32_1 = arith.constant 0 : i32
    return %c0_i32, %c0_i32_0 : i32, i32
  }
  func.func @transform_4(%arg0: i32) -> (i32, i32) {
    %c0_i32 = arith.constant 0 : i32
    %c0_i32_0 = arith.constant 0 : i32
    %c0_i32_1 = arith.constant 0 : i32
    return %c0_i32, %c0_i32_0 : i32, i32
  }
  func.func @transform_5(%arg0: i32) -> (i32, i32) {
    %c0_i32 = arith.constant 0 : i32
    %c0_i32_0 = arith.constant 0 : i32
    %c0_i32_1 = arith.constant 0 : i32
    return %c0_i32, %c0_i32_0 : i32, i32
  }
  func.func @transform_6(%arg0: i32) -> (i32, i32) {
    %c0_i32 = arith.constant 0 : i32
    %c0_i32_0 = arith.constant 0 : i32
    %c0_i32_1 = arith.constant 0 : i32
    return %c0_i32, %c0_i32_0 : i32, i32
  }
  func.func @transform_7(%arg0: i32) -> (i32, i32) {
    %c0_i32 = arith.constant 0 : i32
    %c0_i32_0 = arith.constant 0 : i32
    return %arg0, %c0_i32 : i32, i32
  }
}

</mosaic_0001>

<bundles_post_ra>
// kernel: tpu_custom_call.1
= control target key start
LH: loop header
LB: loop body
LE: loop exit
PB: predicated region body
PF: predicated region fallthrough
CT: control target
= control target key end

     0   :  { %12 = vsyncpa [#allocation3], 0  ;;  %s4321_s0 = inlined_call_operand.hbm [shape: f32[2,2352], index: 0, kind: input, shape index: {}]   ;;  %s4322_s1 = inlined_call_operand.hbm [shape: bf16[2352,256], index: 1, kind: input, shape index: {}]   ;;  %s4323_s2 = inlined_call_operand.hbm [shape: f32[1,256], index: 2, kind: input, shape index: {}]   ;;  %s4324_s3 = inlined_call_operand.hbm [shape: bf16[256,256], index: 3, kind: input, shape index: {}]   ;;  %s4325_s4 = inlined_call_operand.hbm [shape: f32[1,256], index: 4, kind: input, shape index: {}]   ;;  %s4326_s5 = inlined_call_operand.hbm [shape: bf16[256,128], index: 5, kind: input, shape index: {}]   ;;  %s4327_s6 = inlined_call_operand.hbm [shape: f32[1,128], index: 6, kind: input, shape index: {}]   ;;  %s4328_s7 = inlined_call_operand.hbm [shape: bf16[2,128], index: 7, kind: output, shape index: {}]  }
   0x1   :  { %13 = vsyncpa [#allocation6], 0 }
   0x2   :  { %14 = vsyncpa [#allocation9], 0 }
   0x3   :  { %15 = vsyncpa [#allocation12], 0 }
   0x4   :  { %16 = vsyncpa [#allocation4], 0 }
   0x5   :  { %21 = vsyncadd [#allocation3], 1824  ;;  %s4138_s24 = smov [#allocation5]  }
   0x6   :  { %s34_s25 = sshll.u32 %s4138_s24, 4  ;;  %s35_s25 = int_to_ptr.vmem [resolvable:$true] %s34_s25 }
   0x7   :  { %s3976_s26 = scalar_lea.vmem %s35_s25, 37632  ;;  %p3981_p1 = scmp.lt.s32.totalorder %s35_s25, %s35_s25 }
   0x8   :  { %p3977_p0 = scmp.ne.s32.totalorder %s35_s25, %s3976_s26  ;;  %p3982_p2 = scmp.lt.s32.totalorder %s3976_s26, %s3976_s26 }
   0xa   :  { %p3983_p3 = por %p3982_p2, %p3981_p1 }
   0xc   :  { %p3984_p4 = pnand %p3983_p3, %p3977_p0 }
   0xe   :  { %3987 = shalt.err (!%p3984_p4)
}
   0xf   :  { %s4139_s27 = smov 128   ;;  %s4140_s28 = smov 8  }
  0x10   :  { %40 = dma.hbm_to_vmem [thread:$0]  %s4322_s1, 37632, %s35_s25, [#allocation6], %s4139_s27, %s4139_s27, %s4140_s28  }
  0x11   :  { %s4141_s8 = smov [#allocation8]   ;;  %s4142_s10 = smov [#allocation11]  }
  0x12   :  { %s56_s9 = sshll.u32 %s4141_s8, 4  ;;  %s78_s11 = sshll.u32 %s4142_s10, 4  ;;  %s57_s9 = int_to_ptr.vmem [resolvable:$true] %s56_s9  ;;  %s79_s11 = int_to_ptr.vmem [resolvable:$true] %s78_s11 }
  0x13   :  { %s3996_s12 = scalar_lea.vmem %s57_s9, 4096  ;;  %p4001_p6 = scmp.lt.s32.totalorder %s57_s9, %s57_s9 }
  0x14   :  { %p3997_p5 = scmp.ne.s32.totalorder %s57_s9, %s3996_s12  ;;  %p4002_p7 = scmp.lt.s32.totalorder %s3996_s12, %s3996_s12 }
  0x16   :  { %p4003_p8 = por %p4002_p7, %p4001_p6 }
  0x18   :  { %p4004_p9 = pnand %p4003_p8, %p3997_p5 }
  0x1a   :  { %4007 = shalt.err (!%p4004_p9)
}
  0x1b   :  { %62 = dma.hbm_to_vmem [thread:$0]  %s4324_s3, 4096, %s57_s9, [#allocation9], %s4139_s27, %s4139_s27, %s4140_s28  }
  0x1c   :  { %s4016_s15 = scalar_lea.vmem %s79_s11, 2048  ;;  %p4021_p11 = scmp.lt.s32.totalorder %s79_s11, %s79_s11 }
  0x1d   :  { %p4017_p10 = scmp.ne.s32.totalorder %s79_s11, %s4016_s15  ;;  %p4022_p12 = scmp.lt.s32.totalorder %s4016_s15, %s4016_s15 }
  0x1f   :  { %p4023_p13 = por %p4022_p12, %p4021_p11 }
  0x21   :  { %p4024_p0 = pnand %p4023_p13, %p4017_p10 }
  0x23   :  { %4027 = shalt.err (!%p4024_p0)
}
  0x24   :  { %s4143_s1 = smov 64   ;;  %s4144_s16 = smov 4  }
  0x25   :  { %84 = dma.hbm_to_vmem [thread:$0]  %s4326_s5, 2048, %s79_s11, [#allocation12], %s4143_s1, %s4143_s1, %s4144_s16  }
  0x26   :  { %s4145_s19 = smov [#allocation2]  }
  0x27   :  { %s22_s20 = sshll.u32 %s4145_s19, 4  ;;  %s23_s20 = int_to_ptr.vmem [resolvable:$true] %s22_s20 }
  0x28   :  { %s4036_s21 = scalar_lea.vmem %s23_s20, 608  ;;  %s4040_s3 = scalar_lea.vmem %s23_s20, 2432 }
  0x29   :  { %p4037_p1 = scmp.ne.s32.totalorder %s23_s20, %s4036_s21  ;;  %p4041_p2 = scmp.lt.s32.totalorder %s23_s20, %s23_s20 }
  0x2a   :  { %p4042_p3 = scmp.lt.s32.totalorder %s4040_s3, %s4036_s21 }
  0x2c   :  { %p4043_p4 = por %p4042_p3, %p4041_p2 }
  0x2e   :  { %p4044_p5 = pnand %p4043_p4, %p4037_p1 }
  0x30   :  { %4047 = shalt.err (!%p4044_p5)
}
  0x31   :  { %s4146_s22 = smov 608   ;;  %s4147_s23 = smov 38  }
  0x32   :  { %28 = dma.hbm_to_vmem [thread:$0]  %s4321_s0, 608, %s23_s20, [#allocation3], %s4146_s22, %s4146_s22, %s4147_s23  }
  0x33   :  { %s4148_s26 = smov [#allocation7]   ;;  %s4149_s5 = smov [#allocation10]  }
  0x34   :  { %s47_s27 = sshll.u32 %s4148_s26, 4  ;;  %s69_s28 = sshll.u32 %s4149_s5, 4  ;;  %s48_s27 = int_to_ptr.vmem [resolvable:$true] %s47_s27  ;;  %s70_s28 = int_to_ptr.vmem [resolvable:$true] %s69_s28 }
  0x35   :  { %s4056_s29 = scalar_lea.vmem %s48_s27, 32  ;;  %p4061_p7 = scmp.lt.s32.totalorder %s48_s27, %s48_s27 }
  0x36   :  { %p4057_p6 = scmp.ne.s32.totalorder %s48_s27, %s4056_s29  ;;  %p4062_p8 = scmp.lt.s32.totalorder %s4056_s29, %s4056_s29 }
  0x38   :  { %p4063_p9 = por %p4062_p8, %p4061_p7 }
  0x3a   :  { %p4064_p10 = pnand %p4063_p9, %p4057_p6 }
  0x3c   :  { %4067 = shalt.err (!%p4064_p10)
}
  0x3d   :  { %50 = dma.hbm_to_vmem [thread:$0]  %s4323_s2, 32, %s48_s27, [#allocation6]  }
  0x3e   :  { %s4076_s9 = scalar_lea.vmem %s70_s28, 32  ;;  %p4081_p12 = scmp.lt.s32.totalorder %s70_s28, %s70_s28 }
  0x3f   :  { %p4077_p11 = scmp.ne.s32.totalorder %s70_s28, %s4076_s9  ;;  %p4082_p13 = scmp.lt.s32.totalorder %s4076_s9, %s4076_s9 }
  0x41   :  { %p4083_p0 = por %p4082_p13, %p4081_p12 }
  0x43   :  { %p4084_p1 = pnand %p4083_p0, %p4077_p11 }
  0x45   :  { %4087 = shalt.err (!%p4084_p1)
}
  0x46   :  { %72 = dma.hbm_to_vmem [thread:$0]  %s4325_s4, 32, %s70_s28, [#allocation9]  }
  0x47   :  { %s4150_s11 = smov [#allocation13]  }
  0x48   :  { %s91_s12 = sshll.u32 %s4150_s11, 4  ;;  %s92_s12 = int_to_ptr.vmem [resolvable:$true] %s91_s12 }
  0x49   :  { %s4096_s13 = scalar_lea.vmem %s92_s12, 16  ;;  %s4100_s14 = scalar_lea.vmem %s92_s12, 32 }
  0x4a   :  { %p4097_p2 = scmp.ne.s32.totalorder %s92_s12, %s4096_s13  ;;  %p4101_p3 = scmp.lt.s32.totalorder %s92_s12, %s92_s12 }
  0x4b   :  { %p4102_p4 = scmp.lt.s32.totalorder %s4100_s14, %s4096_s13 }
  0x4d   :  { %p4103_p5 = por %p4102_p4, %p4101_p3 }
  0x4f   :  { %p4104_p6 = pnand %p4103_p5, %p4097_p2 }
  0x51   :  { %4107 = shalt.err (!%p4104_p6)
}
  0x52   :  { %94 = dma.hbm_to_vmem [thread:$0]  %s4327_s6, 16, %s92_s12, [#allocation12]  }
  0x53   :  { %4128 = dma.done.wait [#allocation3], 2432  }
  0x54   :  { %4129 = vsyncadd [#allocation3], 4294964864 }
  0x55   :  { %4130 = dma.done.wait [#allocation6], 37664  }
  0x56   :  { %4131 = vsyncadd [#allocation6], 4294929632 }
  0x57   :  { %4132 = dma.done.wait [#allocation9], 4128  }
  0x58   :  { %4133 = vsyncadd [#allocation9], 4294963168 }
  0x59   :  { %4134 = dma.done.wait [#allocation12], 2064  }
  0x5a   :  { %4135 = vsyncadd [#allocation12], 4294965232  ;;  %v3433_v0 = vld [vmem:[#allocation5 + $0x74] ss:$8 sps:$4 sm:$0xff]   ;;  %v3435_v1 = vld [vmem:[#allocation5 + $0x70] ss:$8 sps:$4 sm:$0xff]   ;;  %v164_v39 = vlaneseq }
  0x5b   :  { %2154 = vmatprep.subr.bf16.mxu0 %v3433_v0  ;;  %v3436_v2 = vld [vmem:[#allocation5 + $0x174] ss:$8 sps:$4 sm:$0xff]   ;;  %v3438_v3 = vld [vmem:[#allocation5 + $0x170] ss:$8 sps:$4 sm:$0xff]   ;;  %v3439_v4 = vld [vmem:[#allocation5 + $0x64] ss:$8 sps:$4 sm:$0xff]  }
  0x5c   :  { %2155 = vmatpush1.bf16.msra.mxu0 %v3435_v1  ;;  %v3441_v5 = vld [vmem:[#allocation5 + $0x60] ss:$8 sps:$4 sm:$0xff]   ;;  %2195 = vmatprep.subr.bf16.mxu1 %v3436_v2  ;;  %v3442_v6 = vld [vmem:[#allocation5 + $0x164] ss:$8 sps:$4 sm:$0xff]   ;;  %v3445_v8 = vld [vmem:[#allocation5 + $0x54] ss:$8 sps:$4 sm:$0xff]  }
  0x5d   :  { %2196 = vmatpush1.bf16.msra.mxu1 %v3438_v3  ;;  %2156 = vmatprep.subr.bf16.mxu0 %v3439_v4  ;;  %v3444_v7 = vld [vmem:[#allocation5 + $0x160] ss:$8 sps:$4 sm:$0xff]   ;;  %v3447_v9 = vld [vmem:[#allocation5 + $0x50] ss:$8 sps:$4 sm:$0xff]   ;;  %v3448_v10 = vld [vmem:[#allocation5 + $0x154] ss:$8 sps:$4 sm:$0xff]  }
  0x5e   :  { %2197 = vmatprep.subr.bf16.mxu1 %v3442_v6  ;;  %v3451_v11 = vld [vmem:[#allocation5 + $0x44] ss:$8 sps:$4 sm:$0xff]   ;;  %v3450_v12 = vld [vmem:[#allocation5 + $0x150] ss:$8 sps:$4 sm:$0xff]   ;;  %v3453_v14 = vld [vmem:[#allocation5 + $0x40] ss:$8 sps:$4 sm:$0xff]  }
  0x5f   :  { %v3454_v13 = vld [vmem:[#allocation5 + $0x144] ss:$8 sps:$4 sm:$0xff]   ;;  %v3457_v15 = vld [vmem:[#allocation5 + $0x34] ss:$8 sps:$4 sm:$0xff]   ;;  %v3456_v16 = vld [vmem:[#allocation5 + $0x140] ss:$8 sps:$4 sm:$0xff]  }
  0x60   :  { %2157 = vmatpush1.bf16.msra.mxu0 %v3441_v5  ;;  %v3460_v17 = vld [vmem:[#allocation5 + $0x134] ss:$8 sps:$4 sm:$0xff]   ;;  %v3459_v18 = vld [vmem:[#allocation5 + $0x30] ss:$8 sps:$4 sm:$0xff]   ;;  %v3463_v19 = vld [vmem:[#allocation5 + $0x24] ss:$8 sps:$4 sm:$0xff]  }
  0x61   :  { %2158 = vmatprep.subr.bf16.mxu0 %v3445_v8  ;;  %2198 = vmatpush1.bf16.msra.mxu1 %v3444_v7  ;;  %v3462_v20 = vld [vmem:[#allocation5 + $0x130] ss:$8 sps:$4 sm:$0xff]   ;;  %v3466_v21 = vld [vmem:[#allocation5 + $0x124] ss:$8 sps:$4 sm:$0xff]   ;;  %v3465_v22 = vld [vmem:[#allocation5 + $0x20] ss:$8 sps:$4 sm:$0xff]  }
  0x62   :  { %2199 = vmatprep.subr.bf16.mxu1 %v3448_v10  ;;  %v3469_v23 = vld [vmem:[#allocation5 + $0x14] ss:$8 sps:$4 sm:$0xff]   ;;  %v3468_v24 = vld [vmem:[#allocation5 + $0x120] ss:$8 sps:$4 sm:$0xff]   ;;  %v3471_v26 = vld [vmem:[#allocation5 + $0x10] ss:$8 sps:$4 sm:$0xff]  }
  0x63   :  { %v3472_v25 = vld [vmem:[#allocation5 + $0x114] ss:$8 sps:$4 sm:$0xff]   ;;  %v3475_v27 = vld [vmem:[#allocation5 + $0x4] ss:$8 sps:$4 sm:$0xff]   ;;  %v3474_v28 = vld [vmem:[#allocation5 + $0x110] ss:$8 sps:$4 sm:$0xff]  }
  0x64   :  { %2159 = vmatpush1.bf16.msra.mxu0 %v3447_v9  ;;  %v3478_v29 = vld [vmem:[#allocation5 + $0x104] ss:$8 sps:$4 sm:$0xff]   ;;  %v3477_v30 = vld [vmem:[#allocation5] ss:$8 sps:$4 sm:$0xff]   ;;  %v3481_v31 = vld [vmem:[#allocation5 + $0xf4] ss:$8 sps:$4 sm:$0xff]  }
  0x65   :  { %2160 = vmatprep.subr.bf16.mxu0 %v3451_v11  ;;  %2200 = vmatpush1.bf16.msra.mxu1 %v3450_v12  ;;  %v3480_v32 = vld [vmem:[#allocation5 + $0x100] ss:$8 sps:$4 sm:$0xff]   ;;  %v3484_v33 = vld [vmem:[#allocation5 + $0x1f4] ss:$8 sps:$4 sm:$0xff]   ;;  %v3483_v34 = vld [vmem:[#allocation5 + $0xf0] ss:$8 sps:$4 sm:$0xff]  }
  0x66   :  { %2201 = vmatprep.subr.bf16.mxu1 %v3454_v13  ;;  %v3487_v35 = vld [vmem:[#allocation5 + $0xe4] ss:$8 sps:$4 sm:$0xff]   ;;  %v3486_v36 = vld [vmem:[#allocation5 + $0x1f0] ss:$8 sps:$4 sm:$0xff]   ;;  %v4151_v37 = vmov 1983009808  }
  0x67   :  { %v162_v38 = vunpack.c.l.s4 %v4151_v37  ;;  %v3490_v40 = vld [vmem:[#allocation5 + $0x1e4] ss:$8 sps:$4 sm:$0xff]   ;;  %v3489_v41 = vld [vmem:[#allocation5 + $0xe0] ss:$8 sps:$4 sm:$0xff]   ;;  %v3493_v42 = vld [vmem:[#allocation5 + $0xd4] ss:$8 sps:$4 sm:$0xff]  }
  0x68   :  { %2161 = vmatpush1.bf16.msra.mxu0 %v3453_v14  ;;  %v3492_v43 = vld [vmem:[#allocation5 + $0x1e0] ss:$8 sps:$4 sm:$0xff]   ;;  %v4218_v45 = vshrl.u32 %v164_v39, 7  ;;  %v3496_v46 = vld [vmem:[#allocation5 + $0x1d4] ss:$8 sps:$4 sm:$0xff]   ;;  %vm2150_vm0 = vcmask 392192  }
  0x69   :  { %2162 = vmatprep.subr.bf16.mxu0 %v3457_v15  ;;  %2202 = vmatpush1.bf16.msra.mxu1 %v3456_v16  ;;  %v163_v44 = vunpack.c.0.s8 %v162_v38  ;;  %v3495_v47 = vld [vmem:[#allocation5 + $0xd0] ss:$8 sps:$4 sm:$0xff]   ;;  %v3499_v49 = vld [vmem:[#allocation5 + $0xc4] ss:$8 sps:$4 sm:$0xff]   ;;  %v3501_v50 = vld [vmem:[#allocation5 + $0xc0] ss:$8 sps:$4 sm:$0xff]  }
  0x6a   :  { %2203 = vmatprep.subr.bf16.mxu1 %v3460_v17  ;;  %v3498_v48 = vld [vmem:[#allocation5 + $0x1d0] ss:$8 sps:$4 sm:$0xff]   ;;  %v3502_v52 = vld [vmem:[#allocation5 + $0x1c4] ss:$8 sps:$4 sm:$0xff]   ;;  %v3505_v54 = vld [vmem:[#allocation5 + $0xb4] ss:$8 sps:$4 sm:$0xff]  }
  0x6b   :  { %v4221_v51 = vsub.s32 %v163_v44, %v4218_v45  ;;  %v3528_v53 = vld [vmem:[#allocation2] ss:$38 sps:$4 sm:$0xff]   ;;  %v3530_v55 = vld [vmem:[#allocation2 + $0x4c] ss:$38 sps:$4 sm:$0xff]  }
  0x6c   :  { %2163 = vmatpush1.bf16.msra.mxu0 %v3459_v18  ;;  %v3504_v56 = vld [vmem:[#allocation5 + $0x1c0] ss:$8 sps:$4 sm:$0xff]   ;;  %v3508_v57 = vld [vmem:[#allocation5 + $0x1b4] ss:$8 sps:$4 sm:$0xff]   ;;  %v3507_v62 = vld [vmem:[#allocation5 + $0xb0] ss:$8 sps:$4 sm:$0xff]  }
  0x6d   :  { %2164 = vmatprep.subr.bf16.mxu0 %v3463_v19  ;;  %2204 = vmatpush1.bf16.msra.mxu1 %v3462_v20  ;;  %v167_v58 = vrot.slane %v3528_v53, %v4221_v51  ;;  %v181_v59 = vrot.slane %v3530_v55, %v4221_v51  ;;  %v3536_v60 = vld [vmem:[#allocation2 + $0x4] ss:$38 sps:$4 sm:$0xff]   ;;  %v3537_v61 = vld [vmem:[#allocation2 + $0x50] ss:$38 sps:$4 sm:$0xff]  }
  0x6e   :  { %2205 = vmatprep.subr.bf16.mxu1 %v3466_v21  ;;  %v3511_v63 = vld [vmem:[#allocation5 + $0xa4] ss:$8 sps:$4 sm:$0xff]   ;;  %v174_v1 = vrot.slane %v3536_v60, %v4221_v51  ;;  %v188_v2 = vrot.slane %v3537_v61, %v4221_v51  ;;  %v3510_v3 = vld [vmem:[#allocation5 + $0x1b0] ss:$8 sps:$4 sm:$0xff]   ;;  %v3513_v7 = vld [vmem:[#allocation5 + $0xa0] ss:$8 sps:$4 sm:$0xff]  }
  0x6f   :  { %v190_v0 = vcombine.high %v167_v58, %v181_v59  ;;  %v3514_v4 = vld [vmem:[#allocation5 + $0x1a4] ss:$8 sps:$4 sm:$0xff]   ;;  %v3517_v8 = vld [vmem:[#allocation5 + $0x94] ss:$8 sps:$4 sm:$0xff]   ;;  %v3516_v10 = vld [vmem:[#allocation5 + $0x1a0] ss:$8 sps:$4 sm:$0xff]   ;;  %v189_v16 = vcombine.low %v167_v58, %v181_v59 }
  0x70   :  { %2165 = vmatpush1.bf16.msra.mxu0 %v3465_v22  ;;  %v192_v6 = vcombine.high %v174_v1, %v188_v2  ;;  %v3520_v11 = vld [vmem:[#allocation5 + $0x194] ss:$8 sps:$4 sm:$0xff]   ;;  %v3519_v12 = vld [vmem:[#allocation5 + $0x90] ss:$8 sps:$4 sm:$0xff]   ;;  %v3523_v13 = vld [vmem:[#allocation5 + $0x84] ss:$8 sps:$4 sm:$0xff]   ;;  %v191_v19 = vcombine.low %v174_v1, %v188_v2 }
  0x71   :  { %2166 = vmatprep.subr.bf16.mxu0 %v3469_v23  ;;  %2206 = vmatpush1.bf16.msra.mxu1 %v3468_v24  ;;  %v356_v5 = vpack.c.bf16 %v190_v0, %v190_v0  ;;  %v3522_v14 = vld [vmem:[#allocation5 + $0x190] ss:$8 sps:$4 sm:$0xff]   ;;  %v3526_v15 = vld [vmem:[#allocation5 + $0x184] ss:$8 sps:$4 sm:$0xff]   ;;  %v3525_v17 = vld [vmem:[#allocation5 + $0x80] ss:$8 sps:$4 sm:$0xff]   ;;  %v355_v21 = vpack.c.bf16 %v189_v16, %v189_v16 }
  0x72   :  { %2207 = vmatprep.subr.bf16.mxu1 %v3472_v25  ;;  %v358_v9 = vpack.c.bf16 %v192_v6, %v192_v6  ;;  %v3535_v18 = vld [vmem:[#allocation5 + $0x274] ss:$8 sps:$4 sm:$0xff]   ;;  %v3532_v20 = vld [vmem:[#allocation5 + $0x180] ss:$8 sps:$4 sm:$0xff]   ;;  %v3533_v23 = vld [vmem:[#allocation5 + $0x270] ss:$8 sps:$4 sm:$0xff]   ;;  %v357_v24 = vpack.c.bf16 %v191_v19, %v191_v19 }
  0x73   :  { %2186 = vmatprep.mubr.bf16.mxu0 %v356_v5  ;;  %v3540_v22 = vld [vmem:[#allocation5 + $0x374] ss:$8 sps:$4 sm:$0xff]   ;;  %v3543_v25 = vld [vmem:[#allocation5 + $0x264] ss:$8 sps:$4 sm:$0xff]   ;;  %v3556_v38 = vld [vmem:[#allocation5 + $0x340] ss:$8 sps:$4 sm:$0xff]  }
  0x74   :  { %2167 = vmatpush1.bf16.msra.mxu0 %v3471_v26  ;;  %2227 = vmatprep.mubr.bf16.mxu1 %v358_v9  ;;  %v3538_v26 = vld [vmem:[#allocation5 + $0x370] ss:$8 sps:$4 sm:$0xff]   ;;  %v3561_v37 = vld [vmem:[#allocation5 + $0x234] ss:$8 sps:$4 sm:$0xff]   ;;  %v3565_v44 = vld [vmem:[#allocation5 + $0x220] ss:$8 sps:$4 sm:$0xff]  }
  0x75   :  { %2168 = vmatprep.subr.bf16.mxu0 %v3475_v27  ;;  %2208 = vmatpush1.bf16.msra.mxu1 %v3474_v28  ;;  %v3546_v27 = vld [vmem:[#allocation5 + $0x364] ss:$8 sps:$4 sm:$0xff]   ;;  %v3541_v28 = vld [vmem:[#allocation5 + $0x260] ss:$8 sps:$4 sm:$0xff]   ;;  %v3564_v39 = vld [vmem:[#allocation5 + $0x334] ss:$8 sps:$4 sm:$0xff]  }
  0x76   :  { %2209 = vmatprep.subr.bf16.mxu1 %v3478_v29  ;;  %v3549_v29 = vld [vmem:[#allocation5 + $0x254] ss:$8 sps:$4 sm:$0xff]   ;;  %v3582_v55 = vld [vmem:[#allocation5 + $0x304] ss:$8 sps:$4 sm:$0xff]   ;;  %v3598_v16 = vld [vmem:[#allocation5 + $0x3d0] ss:$8 sps:$4 sm:$0xff]  }
  0x77   :  { %v3631_v53 = vld [vmem:[#allocation2 + $0x8] ss:$38 sps:$4 sm:$0xff]   ;;  %v3639_v60 = vld [vmem:[#allocation2 + $0x58] ss:$38 sps:$4 sm:$0xff]  }
  0x78   :  { %2169 = vmatpush1.bf16.msra.mxu0 %v3477_v30  ;;  %v3544_v30 = vld [vmem:[#allocation5 + $0x360] ss:$8 sps:$4 sm:$0xff]   ;;  %v3638_v59 = vld [vmem:[#allocation2 + $0xc] ss:$38 sps:$4 sm:$0xff]   ;;  %v4239_v1 = vrot.slane %v3639_v60, %v4221_v51  ;;  %v3591_v6 = vld [vmem:[#allocation5 + $0x2e4] ss:$8 sps:$4 sm:$0xff]  }
  0x79   :  { %2170 = vmatprep.subr.bf16.mxu0 %v3481_v31  ;;  %2210 = vmatpush1.bf16.msra.mxu1 %v3480_v32  ;;  %v3552_v31 = vld [vmem:[#allocation5 + $0x354] ss:$8 sps:$4 sm:$0xff]   ;;  %v3547_v32 = vld [vmem:[#allocation5 + $0x250] ss:$8 sps:$4 sm:$0xff]   ;;  %v4236_v0 = vrot.slane %v3638_v59, %v4221_v51  ;;  %v3594_v9 = vld [vmem:[#allocation5 + $0x3e4] ss:$8 sps:$4 sm:$0xff]  }
  0x7a   :  { %2211 = vmatprep.subr.bf16.mxu1 %v3484_v33  ;;  %v3555_v33 = vld [vmem:[#allocation5 + $0x244] ss:$8 sps:$4 sm:$0xff]   ;;  %v3585_v61 = vld [vmem:[#allocation5 + $0x2f4] ss:$8 sps:$4 sm:$0xff]  }
  0x7b   :  { %v3588_v2 = vld [vmem:[#allocation5 + $0x3f4] ss:$8 sps:$4 sm:$0xff]   ;;  %v228_v5 = vcombine.high %v4236_v0, %v4239_v1  ;;  %v3741_v60 = vld [vmem:[#allocation2 + $0x60] ss:$38 sps:$4 sm:$0xff]  }
  0x7c   :  { %2171 = vmatpush2.bf16.msra.mxu0 %v3483_v34  ;;  %v3550_v34 = vld [vmem:[#allocation5 + $0x350] ss:$8 sps:$4 sm:$0xff]   ;;  %v3609_v19 = vld [vmem:[#allocation5 + $0x2b4] ss:$8 sps:$4 sm:$0xff]  }
  0x7d   :  { %2172 = vmatprep.subr.bf16.mxu0 %v3487_v35  ;;  %2212 = vmatpush2.bf16.msra.mxu1 %v3486_v36  ;;  %v3558_v35 = vld [vmem:[#allocation5 + $0x344] ss:$8 sps:$4 sm:$0xff]   ;;  %v3553_v36 = vld [vmem:[#allocation5 + $0x240] ss:$8 sps:$4 sm:$0xff]  }
  0x7e   :  { %2213 = vmatprep.subr.bf16.mxu1 %v3490_v40  ;;  %v3559_v40 = vld [vmem:[#allocation5 + $0x230] ss:$8 sps:$4 sm:$0xff]  }
  0x80   :  { %2173 = vmatpush2.bf16.msra.mxu0 %v3489_v41  ;;  %v3567_v41 = vld [vmem:[#allocation5 + $0x224] ss:$8 sps:$4 sm:$0xff]  }
  0x81   :  { %2174 = vmatprep.subr.bf16.mxu0 %v3493_v42  ;;  %2214 = vmatpush2.bf16.msra.mxu1 %v3492_v43  ;;  %v3562_v42 = vld [vmem:[#allocation5 + $0x330] ss:$8 sps:$4 sm:$0xff]   ;;  %v3570_v43 = vld [vmem:[#allocation5 + $0x324] ss:$8 sps:$4 sm:$0xff]  }
  0x82   :  { %2215 = vmatprep.subr.bf16.mxu1 %v3496_v46  ;;  %v3573_v46 = vld [vmem:[#allocation5 + $0x214] ss:$8 sps:$4 sm:$0xff]  }
  0x84   :  { %2175 = vmatpush2.bf16.msra.mxu0 %v3495_v47  ;;  %v3568_v47 = vld [vmem:[#allocation5 + $0x320] ss:$8 sps:$4 sm:$0xff]  }
  0x85   :  { %2176 = vmatprep.subr.bf16.mxu0 %v3499_v49  ;;  %2216 = vmatpush2.bf16.msra.mxu1 %v3498_v48  ;;  %v3571_v48 = vld [vmem:[#allocation5 + $0x210] ss:$8 sps:$4 sm:$0xff]   ;;  %v3576_v49 = vld [vmem:[#allocation5 + $0x314] ss:$8 sps:$4 sm:$0xff]  }
  0x86   :  { %2217 = vmatprep.subr.bf16.mxu1 %v3502_v52  ;;  %v3579_v52 = vld [vmem:[#allocation5 + $0x204] ss:$8 sps:$4 sm:$0xff]  }
  0x88   :  { %2177 = vmatpush2.bf16.msra.mxu0 %v3501_v50  ;;  %v3574_v50 = vld [vmem:[#allocation5 + $0x310] ss:$8 sps:$4 sm:$0xff]  }
  0x89   :  { %2178 = vmatprep.subr.bf16.mxu0 %v3505_v54  ;;  %2218 = vmatpush2.bf16.msra.mxu1 %v3504_v56  ;;  %v3633_v54 = vld [vmem:[#allocation2 + $0x54] ss:$38 sps:$4 sm:$0xff]  }
  0x8a   :  { %2219 = vmatprep.subr.bf16.mxu1 %v3508_v57  ;;  %v3577_v56 = vld [vmem:[#allocation5 + $0x200] ss:$8 sps:$4 sm:$0xff]   ;;  %v4228_v57 = vrot.slane %v3631_v53, %v4221_v51  ;;  %v4231_v58 = vrot.slane %v3633_v54, %v4221_v51 }
  0x8b   :  { %v3733_v53 = vld [vmem:[#allocation2 + $0x10] ss:$38 sps:$4 sm:$0xff]   ;;  %v3735_v54 = vld [vmem:[#allocation2 + $0x5c] ss:$38 sps:$4 sm:$0xff]  }
  0x8c   :  { %2179 = vmatpush2.bf16.msra.mxu0 %v3507_v62  ;;  %v3580_v62 = vld [vmem:[#allocation5 + $0x300] ss:$8 sps:$4 sm:$0xff]   ;;  %v4251_v59 = vrot.slane %v3735_v54, %v4221_v51 }
  0x8d   :  { %2180 = vmatprep.subr.bf16.mxu0 %v3511_v63  ;;  %2220 = vmatpush2.bf16.msra.mxu1 %v3510_v3  ;;  %v226_v63 = vcombine.high %v4228_v57, %v4231_v58  ;;  %v3583_v3 = vld [vmem:[#allocation5 + $0x2f0] ss:$8 sps:$4 sm:$0xff]   ;;  %v3842_v54 = vld [vmem:[#allocation2 + $0x1c] ss:$38 sps:$4 sm:$0xff]  }
  0x8e   :  { %2221 = vmatprep.subr.bf16.mxu1 %v3514_v4 }
  0x8f   :  { %v360_v4 = vpack.c.bf16 %v226_v63, %v226_v63  ;;  %v3655_v63 = vld [vmem:[#allocation5 + $0x440] ss:$8 sps:$4 sm:$0xff]  }
  0x90   :  { %2181 = vmatpush2.bf16.msra.mxu0 %v3513_v7  ;;  %v3586_v7 = vld [vmem:[#allocation5 + $0x3f0] ss:$8 sps:$4 sm:$0xff]  }
  0x91   :  { %2182 = vmatprep.subr.bf16.mxu0 %v3517_v8  ;;  %2222 = vmatpush2.bf16.msra.mxu1 %v3516_v10  ;;  %v362_v8 = vpack.c.bf16 %v228_v5, %v228_v5  ;;  %v3589_v10 = vld [vmem:[#allocation5 + $0x2e0] ss:$8 sps:$4 sm:$0xff]  }
  0x92   :  { %2223 = vmatprep.subr.bf16.mxu1 %v3520_v11  ;;  %v3597_v11 = vld [vmem:[#allocation5 + $0x2d4] ss:$8 sps:$4 sm:$0xff]  }
  0x94   :  { %2183 = vmatpush2.bf16.msra.mxu0 %v3519_v12  ;;  %v3592_v12 = vld [vmem:[#allocation5 + $0x3e0] ss:$8 sps:$4 sm:$0xff]  }
  0x95   :  { %2184 = vmatprep.subr.bf16.mxu0 %v3523_v13  ;;  %2224 = vmatpush2.bf16.msra.mxu1 %v3522_v14  ;;  %v3600_v13 = vld [vmem:[#allocation5 + $0x3d4] ss:$8 sps:$4 sm:$0xff]   ;;  %v3595_v14 = vld [vmem:[#allocation5 + $0x2d0] ss:$8 sps:$4 sm:$0xff]  }
  0x96   :  { %2225 = vmatprep.subr.bf16.mxu1 %v3526_v15  ;;  %v3603_v15 = vld [vmem:[#allocation5 + $0x2c4] ss:$8 sps:$4 sm:$0xff]  }
  0x98   :  { %2185 = vmatpush2.bf16.msra.mxu0 %v3525_v17  ;;  %v3606_v17 = vld [vmem:[#allocation5 + $0x3c4] ss:$8 sps:$4 sm:$0xff]  }
  0x99   :  { %2236 = vmatprep.subr.bf16.mxu0 %v3535_v18  ;;  %2226 = vmatpush2.bf16.msra.mxu1 %v3532_v20  ;;  %v3601_v18 = vld [vmem:[#allocation5 + $0x2c0] ss:$8 sps:$4 sm:$0xff]  }
  0x9a   :  { %2277 = vmatprep.subr.bf16.mxu1 %v3540_v22  ;;  %v3604_v20 = vld [vmem:[#allocation5 + $0x3c0] ss:$8 sps:$4 sm:$0xff]   ;;  %v3607_v22 = vld [vmem:[#allocation5 + $0x2b0] ss:$8 sps:$4 sm:$0xff]  }
  0x9b   :  { %2187 = vmatmul.mubr.bf16.vlgmr.msra.gmra.mxu0 %v355_v21  ;;  %v3612_v21 = vld [vmem:[#allocation5 + $0x3b4] ss:$8 sps:$4 sm:$0xff]  }
  0x9c   :  { %2237 = vmatpush1.bf16.msra.mxu0 %v3533_v23  ;;  %2228 = vmatmul.mubr.bf16.vlgmr.msra.gmra.mxu1 %v357_v24  ;;  %v3615_v23 = vld [vmem:[#allocation5 + $0x2a4] ss:$8 sps:$4 sm:$0xff]   ;;  %v3610_v24 = vld [vmem:[#allocation5 + $0x3b0] ss:$8 sps:$4 sm:$0xff]  }
  0x9d   :  { %2238 = vmatprep.subr.bf16.mxu0 %v3543_v25  ;;  %2278 = vmatpush1.bf16.msra.mxu1 %v3538_v26  ;;  %v3618_v25 = vld [vmem:[#allocation5 + $0x3a4] ss:$8 sps:$4 sm:$0xff]   ;;  %v3613_v26 = vld [vmem:[#allocation5 + $0x2a0] ss:$8 sps:$4 sm:$0xff]  }
  0x9e   :  { %2279 = vmatprep.subr.bf16.mxu1 %v3546_v27  ;;  %2268 = vmatprep.mubr.bf16.mxu0 %v360_v4  ;;  %v3621_v27 = vld [vmem:[#allocation5 + $0x294] ss:$8 sps:$4 sm:$0xff]  }
  0x9f   :  { %2309 = vmatprep.mubr.bf16.mxu1 %v362_v8 }
  0xa0   :  { %2239 = vmatpush1.bf16.msra.mxu0 %v3541_v28  ;;  %v3616_v28 = vld [vmem:[#allocation5 + $0x3a0] ss:$8 sps:$4 sm:$0xff]  }
  0xa1   :  { %2240 = vmatprep.subr.bf16.mxu0 %v3549_v29  ;;  %2280 = vmatpush1.bf16.msra.mxu1 %v3544_v30  ;;  %v3624_v29 = vld [vmem:[#allocation5 + $0x394] ss:$8 sps:$4 sm:$0xff]   ;;  %v3619_v30 = vld [vmem:[#allocation5 + $0x290] ss:$8 sps:$4 sm:$0xff]  }
  0xa2   :  { %2281 = vmatprep.subr.bf16.mxu1 %v3552_v31  ;;  %v3627_v31 = vld [vmem:[#allocation5 + $0x284] ss:$8 sps:$4 sm:$0xff]  }
  0xa4   :  { %2241 = vmatpush1.bf16.msra.mxu0 %v3547_v32  ;;  %v3622_v32 = vld [vmem:[#allocation5 + $0x390] ss:$8 sps:$4 sm:$0xff]  }
  0xa5   :  { %2242 = vmatprep.subr.bf16.mxu0 %v3555_v33  ;;  %2282 = vmatpush1.bf16.msra.mxu1 %v3550_v34  ;;  %v3630_v33 = vld [vmem:[#allocation5 + $0x384] ss:$8 sps:$4 sm:$0xff]   ;;  %v225_v34 = vcombine.low %v4228_v57, %v4231_v58  ;;  %v4248_v57 = vrot.slane %v3733_v53, %v4221_v51 }
  0xa6   :  { %2283 = vmatprep.subr.bf16.mxu1 %v3558_v35  ;;  %v3625_v35 = vld [vmem:[#allocation5 + $0x280] ss:$8 sps:$4 sm:$0xff]  }
  0xa7   :  { %v3740_v58 = vld [vmem:[#allocation2 + $0x14] ss:$38 sps:$4 sm:$0xff]  }
  0xa8   :  { %2243 = vmatpush1.bf16.msra.mxu0 %v3553_v36  ;;  %v3637_v36 = vld [vmem:[#allocation5 + $0x474] ss:$8 sps:$4 sm:$0xff]  }
  0xa9   :  { %2244 = vmatprep.subr.bf16.mxu0 %v3561_v37  ;;  %2284 = vmatpush1.bf16.msra.mxu1 %v3556_v38  ;;  %v227_v37 = vcombine.low %v4236_v0, %v4239_v1  ;;  %v3628_v38 = vld [vmem:[#allocation5 + $0x380] ss:$8 sps:$4 sm:$0xff]   ;;  %v262_v0 = vcombine.high %v4248_v57, %v4251_v59  ;;  %v4259_v1 = vrot.slane %v3741_v60, %v4221_v51 }
  0xaa   :  { %2285 = vmatprep.subr.bf16.mxu1 %v3564_v39  ;;  %v359_v39 = vpack.c.bf16 %v225_v34, %v225_v34  ;;  %v3700_v34 = vld [vmem:[#allocation5 + $0x5d0] ss:$8 sps:$4 sm:$0xff]  }
  0xab   :  { %v364_v4 = vpack.c.bf16 %v262_v0, %v262_v0  ;;  %v3724_v0 = vld [vmem:[#allocation5 + $0x590] ss:$8 sps:$4 sm:$0xff]  }
  0xac   :  { %2245 = vmatpush1.bf16.msra.mxu0 %v3559_v40  ;;  %v3642_v40 = vld [vmem:[#allocation5 + $0x574] ss:$8 sps:$4 sm:$0xff]  }
  0xad   :  { %2246 = vmatprep.subr.bf16.mxu0 %v3567_v41  ;;  %2286 = vmatpush1.bf16.msra.mxu1 %v3562_v42  ;;  %v3635_v41 = vld [vmem:[#allocation5 + $0x470] ss:$8 sps:$4 sm:$0xff]   ;;  %v361_v42 = vpack.c.bf16 %v227_v37, %v227_v37  ;;  %v3711_v37 = vld [vmem:[#allocation5 + $0x4b4] ss:$8 sps:$4 sm:$0xff]  }
  0xae   :  { %2287 = vmatprep.subr.bf16.mxu1 %v3570_v43  ;;  %v3645_v43 = vld [vmem:[#allocation5 + $0x464] ss:$8 sps:$4 sm:$0xff]  }
  0xb0   :  { %2247 = vmatpush1.bf16.msra.mxu0 %v3565_v44  ;;  %v3640_v44 = vld [vmem:[#allocation5 + $0x570] ss:$8 sps:$4 sm:$0xff]  }
  0xb1   :  { %2248 = vmatprep.subr.bf16.mxu0 %v3573_v46  ;;  %2288 = vmatpush1.bf16.msra.mxu1 %v3568_v47  ;;  %v3648_v46 = vld [vmem:[#allocation5 + $0x564] ss:$8 sps:$4 sm:$0xff]   ;;  %v3643_v47 = vld [vmem:[#allocation5 + $0x460] ss:$8 sps:$4 sm:$0xff]  }
  0xb2   :  { %2289 = vmatprep.subr.bf16.mxu1 %v3576_v49  ;;  %v3651_v49 = vld [vmem:[#allocation5 + $0x454] ss:$8 sps:$4 sm:$0xff]  }
  0xb4   :  { %2249 = vmatpush1.bf16.msra.mxu0 %v3571_v48  ;;  %v3646_v48 = vld [vmem:[#allocation5 + $0x560] ss:$8 sps:$4 sm:$0xff]  }
  0xb5   :  { %2250 = vmatprep.subr.bf16.mxu0 %v3579_v52  ;;  %2290 = vmatpush1.bf16.msra.mxu1 %v3574_v50  ;;  %v3649_v50 = vld [vmem:[#allocation5 + $0x450] ss:$8 sps:$4 sm:$0xff]   ;;  %v3654_v52 = vld [vmem:[#allocation5 + $0x554] ss:$8 sps:$4 sm:$0xff]  }
  0xb6   :  { %2291 = vmatprep.subr.bf16.mxu1 %v3582_v55  ;;  %v3652_v55 = vld [vmem:[#allocation5 + $0x550] ss:$8 sps:$4 sm:$0xff]  }
  0xb8   :  { %2251 = vmatpush1.bf16.msra.mxu0 %v3577_v56  ;;  %v3657_v56 = vld [vmem:[#allocation5 + $0x444] ss:$8 sps:$4 sm:$0xff]  }
  0xb9   :  { %2252 = vmatprep.subr.bf16.mxu0 %v3585_v61  ;;  %2292 = vmatpush1.bf16.msra.mxu1 %v3580_v62  ;;  %v3660_v61 = vld [vmem:[#allocation5 + $0x544] ss:$8 sps:$4 sm:$0xff]   ;;  %v4254_v62 = vrot.slane %v3740_v58, %v4221_v51 }
  0xba   :  { %2293 = vmatprep.subr.bf16.mxu1 %v3588_v2  ;;  %v3663_v2 = vld [vmem:[#allocation5 + $0x434] ss:$8 sps:$4 sm:$0xff]   ;;  %v3729_v58 = vld [vmem:[#allocation5 + $0x484] ss:$8 sps:$4 sm:$0xff]  }
  0xbb   :  { %v264_v5 = vcombine.high %v4254_v62, %v4259_v1 }
  0xbc   :  { %2253 = vmatpush2.bf16.msra.mxu0 %v3583_v3  ;;  %v3658_v3 = vld [vmem:[#allocation5 + $0x540] ss:$8 sps:$4 sm:$0xff]  }
  0xbd   :  { %2254 = vmatprep.subr.bf16.mxu0 %v3591_v6  ;;  %2294 = vmatpush2.bf16.msra.mxu1 %v3586_v7  ;;  %v3666_v6 = vld [vmem:[#allocation5 + $0x534] ss:$8 sps:$4 sm:$0xff]   ;;  %v3661_v7 = vld [vmem:[#allocation5 + $0x430] ss:$8 sps:$4 sm:$0xff]   ;;  %v366_v8 = vpack.c.bf16 %v264_v5, %v264_v5  ;;  %v3727_v5 = vld [vmem:[#allocation5 + $0x480] ss:$8 sps:$4 sm:$0xff]  }
  0xbe   :  { %2295 = vmatprep.subr.bf16.mxu1 %v3594_v9  ;;  %v3669_v9 = vld [vmem:[#allocation5 + $0x424] ss:$8 sps:$4 sm:$0xff]  }
  0xc0   :  { %2255 = vmatpush2.bf16.msra.mxu0 %v3589_v10  ;;  %v3664_v10 = vld [vmem:[#allocation5 + $0x530] ss:$8 sps:$4 sm:$0xff]  }
  0xc1   :  { %2256 = vmatprep.subr.bf16.mxu0 %v3597_v11  ;;  %2296 = vmatpush2.bf16.msra.mxu1 %v3592_v12  ;;  %v3672_v11 = vld [vmem:[#allocation5 + $0x524] ss:$8 sps:$4 sm:$0xff]   ;;  %v3667_v12 = vld [vmem:[#allocation5 + $0x420] ss:$8 sps:$4 sm:$0xff]  }
  0xc2   :  { %2297 = vmatprep.subr.bf16.mxu1 %v3600_v13  ;;  %v3675_v13 = vld [vmem:[#allocation5 + $0x414] ss:$8 sps:$4 sm:$0xff]  }
  0xc4   :  { %2257 = vmatpush2.bf16.msra.mxu0 %v3595_v14  ;;  %v3670_v14 = vld [vmem:[#allocation5 + $0x520] ss:$8 sps:$4 sm:$0xff]  }
  0xc5   :  { %2258 = vmatprep.subr.bf16.mxu0 %v3603_v15  ;;  %2298 = vmatpush2.bf16.msra.mxu1 %v3598_v16  ;;  %v3678_v15 = vld [vmem:[#allocation5 + $0x514] ss:$8 sps:$4 sm:$0xff]   ;;  %v3673_v16 = vld [vmem:[#allocation5 + $0x410] ss:$8 sps:$4 sm:$0xff]  }
  0xc6   :  { %2299 = vmatprep.subr.bf16.mxu1 %v3606_v17  ;;  %v3681_v17 = vld [vmem:[#allocation5 + $0x404] ss:$8 sps:$4 sm:$0xff]  }
  0xc8   :  { %2259 = vmatpush2.bf16.msra.mxu0 %v3601_v18  ;;  %v3676_v18 = vld [vmem:[#allocation5 + $0x510] ss:$8 sps:$4 sm:$0xff]  }
  0xc9   :  { %2260 = vmatprep.subr.bf16.mxu0 %v3609_v19  ;;  %2300 = vmatpush2.bf16.msra.mxu1 %v3604_v20  ;;  %v3684_v19 = vld [vmem:[#allocation5 + $0x504] ss:$8 sps:$4 sm:$0xff]   ;;  %v3679_v20 = vld [vmem:[#allocation5 + $0x400] ss:$8 sps:$4 sm:$0xff]  }
  0xca   :  { %2301 = vmatprep.subr.bf16.mxu1 %v3612_v21  ;;  %v3687_v21 = vld [vmem:[#allocation5 + $0x4f4] ss:$8 sps:$4 sm:$0xff]  }
  0xcc   :  { %2261 = vmatpush2.bf16.msra.mxu0 %v3607_v22  ;;  %v3682_v22 = vld [vmem:[#allocation5 + $0x500] ss:$8 sps:$4 sm:$0xff]  }
  0xcd   :  { %2262 = vmatprep.subr.bf16.mxu0 %v3615_v23  ;;  %2302 = vmatpush2.bf16.msra.mxu1 %v3610_v24  ;;  %v3690_v23 = vld [vmem:[#allocation5 + $0x5f4] ss:$8 sps:$4 sm:$0xff]   ;;  %v3685_v24 = vld [vmem:[#allocation5 + $0x4f0] ss:$8 sps:$4 sm:$0xff]  }
  0xce   :  { %2303 = vmatprep.subr.bf16.mxu1 %v3618_v25  ;;  %v3693_v25 = vld [vmem:[#allocation5 + $0x4e4] ss:$8 sps:$4 sm:$0xff]  }
  0xd0   :  { %2263 = vmatpush2.bf16.msra.mxu0 %v3613_v26  ;;  %v3688_v26 = vld [vmem:[#allocation5 + $0x5f0] ss:$8 sps:$4 sm:$0xff]  }
  0xd1   :  { %2264 = vmatprep.subr.bf16.mxu0 %v3621_v27  ;;  %2304 = vmatpush2.bf16.msra.mxu1 %v3616_v28  ;;  %v3696_v27 = vld [vmem:[#allocation5 + $0x5e4] ss:$8 sps:$4 sm:$0xff]   ;;  %v3691_v28 = vld [vmem:[#allocation5 + $0x4e0] ss:$8 sps:$4 sm:$0xff]  }
  0xd2   :  { %2305 = vmatprep.subr.bf16.mxu1 %v3624_v29  ;;  %v3699_v29 = vld [vmem:[#allocation5 + $0x4d4] ss:$8 sps:$4 sm:$0xff]  }
  0xd4   :  { %2265 = vmatpush2.bf16.msra.mxu0 %v3619_v30  ;;  %v3694_v30 = vld [vmem:[#allocation5 + $0x5e0] ss:$8 sps:$4 sm:$0xff]  }
  0xd5   :  { %2266 = vmatprep.subr.bf16.mxu0 %v3627_v31  ;;  %2306 = vmatpush2.bf16.msra.mxu1 %v3622_v32  ;;  %v3702_v31 = vld [vmem:[#allocation5 + $0x5d4] ss:$8 sps:$4 sm:$0xff]   ;;  %v3697_v32 = vld [vmem:[#allocation5 + $0x4d0] ss:$8 sps:$4 sm:$0xff]  }
  0xd6   :  { %2307 = vmatprep.subr.bf16.mxu1 %v3630_v33  ;;  %v3705_v33 = vld [vmem:[#allocation5 + $0x4c4] ss:$8 sps:$4 sm:$0xff]  }
  0xd8   :  { %2267 = vmatpush2.bf16.msra.mxu0 %v3625_v35  ;;  %v3708_v35 = vld [vmem:[#allocation5 + $0x5c4] ss:$8 sps:$4 sm:$0xff]  }
  0xd9   :  { %2318 = vmatprep.subr.bf16.mxu0 %v3637_v36  ;;  %2308 = vmatpush2.bf16.msra.mxu1 %v3628_v38  ;;  %v3703_v36 = vld [vmem:[#allocation5 + $0x4c0] ss:$8 sps:$4 sm:$0xff]  }
  0xda   :  { %2359 = vmatprep.subr.bf16.mxu1 %v3642_v40  ;;  %v3706_v38 = vld [vmem:[#allocation5 + $0x5c0] ss:$8 sps:$4 sm:$0xff]   ;;  %v3709_v40 = vld [vmem:[#allocation5 + $0x4b0] ss:$8 sps:$4 sm:$0xff]  }
  0xdb   :  { %2269 = vmatmul.mubr.bf16.vlgmr.msra.gmra.mxu0 %v359_v39  ;;  %v3714_v39 = vld [vmem:[#allocation5 + $0x5b4] ss:$8 sps:$4 sm:$0xff]  }
  0xdc   :  { %2319 = vmatpush1.bf16.msra.mxu0 %v3635_v41  ;;  %2310 = vmatmul.mubr.bf16.vlgmr.msra.gmra.mxu1 %v361_v42  ;;  %v3717_v41 = vld [vmem:[#allocation5 + $0x4a4] ss:$8 sps:$4 sm:$0xff]   ;;  %v3712_v42 = vld [vmem:[#allocation5 + $0x5b0] ss:$8 sps:$4 sm:$0xff]  }
  0xdd   :  { %2320 = vmatprep.subr.bf16.mxu0 %v3645_v43  ;;  %2360 = vmatpush1.bf16.msra.mxu1 %v3640_v44  ;;  %v3715_v43 = vld [vmem:[#allocation5 + $0x4a0] ss:$8 sps:$4 sm:$0xff]   ;;  %v3720_v44 = vld [vmem:[#allocation5 + $0x5a4] ss:$8 sps:$4 sm:$0xff]  }
  0xde   :  { %2361 = vmatprep.subr.bf16.mxu1 %v3648_v46  ;;  %2350 = vmatprep.mubr.bf16.mxu0 %v364_v4  ;;  %v3723_v46 = vld [vmem:[#allocation5 + $0x494] ss:$8 sps:$4 sm:$0xff]  }
  0xdf   :  { %2391 = vmatprep.mubr.bf16.mxu1 %v366_v8  ;;  %v263_v8 = vcombine.low %v4254_v62, %v4259_v1  ;;  %v3745_v62 = vld [vmem:[#allocation5 + $0x660] ss:$8 sps:$4 sm:$0xff]   ;;  %v3753_v1 = vld [vmem:[#allocation5 + $0x654] ss:$8 sps:$4 sm:$0xff]  }
  0xe0   :  { %2321 = vmatpush1.bf16.msra.mxu0 %v3643_v47  ;;  %v3835_v47 = vld [vmem:[#allocation2 + $0x18] ss:$38 sps:$4 sm:$0xff]  }
  0xe1   :  { %2322 = vmatprep.subr.bf16.mxu0 %v3651_v49  ;;  %2362 = vmatpush1.bf16.msra.mxu1 %v3646_v48  ;;  %v3837_v48 = vld [vmem:[#allocation2 + $0x64] ss:$38 sps:$4 sm:$0xff]   ;;  %v3718_v49 = vld [vmem:[#allocation5 + $0x5a0] ss:$8 sps:$4 sm:$0xff]  }
  0xe2   :  { %2363 = vmatprep.subr.bf16.mxu1 %v3654_v52  ;;  %v275_v52 = vrot.slane %v3835_v47, %v4221_v51  ;;  %v289_v53 = vrot.slane %v3837_v48, %v4221_v51  ;;  %v3789_v47 = vld [vmem:[#allocation5 + $0x6f4] ss:$8 sps:$4 sm:$0xff]   ;;  %v3784_v48 = vld [vmem:[#allocation5 + $0x700] ss:$8 sps:$4 sm:$0xff]  }
  0xe4   :  { %2323 = vmatpush1.bf16.msra.mxu0 %v3649_v50  ;;  %v3726_v50 = vld [vmem:[#allocation5 + $0x594] ss:$8 sps:$4 sm:$0xff]   ;;  %v4265_v60 = vcombine.low %v275_v52, %v289_v53 }
  0xe5   :  { %2324 = vmatprep.subr.bf16.mxu0 %v3657_v56  ;;  %2364 = vmatpush1.bf16.msra.mxu1 %v3652_v55  ;;  %v3843_v55 = vld [vmem:[#allocation2 + $0x68] ss:$38 sps:$4 sm:$0xff]  }
  0xe6   :  { %2365 = vmatprep.subr.bf16.mxu1 %v3660_v61  ;;  %v3721_v56 = vld [vmem:[#allocation5 + $0x490] ss:$8 sps:$4 sm:$0xff]   ;;  %v282_v61 = vrot.slane %v3842_v54, %v4221_v51  ;;  %v3798_v54 = vld [vmem:[#allocation5 + $0x7e4] ss:$8 sps:$4 sm:$0xff]  }
  0xe8   :  { %2325 = vmatpush1.bf16.msra.mxu0 %v3655_v63  ;;  %v296_v63 = vrot.slane %v3843_v55, %v4221_v51  ;;  %v3793_v55 = vld [vmem:[#allocation5 + $0x6e0] ss:$8 sps:$4 sm:$0xff]  }
  0xe9   :  { %2326 = vmatprep.subr.bf16.mxu0 %v3663_v2  ;;  %2366 = vmatpush1.bf16.msra.mxu1 %v3658_v3  ;;  %v3732_v2 = vld [vmem:[#allocation5 + $0x584] ss:$8 sps:$4 sm:$0xff]   ;;  %v261_v3 = vcombine.low %v4248_v57, %v4251_v59  ;;  %v365_v57 = vpack.c.bf16 %v263_v8, %v263_v8  ;;  %v3816_v8 = vld [vmem:[#allocation5 + $0x7b4] ss:$8 sps:$4 sm:$0xff]  }
  0xea   :  { %2367 = vmatprep.subr.bf16.mxu1 %v3666_v6  ;;  %v4271_v4 = vcombine.low %v282_v61, %v296_v63  ;;  %v298_v6 = vcombine.high %v275_v52, %v289_v53  ;;  %v3747_v59 = vld [vmem:[#allocation5 + $0x664] ss:$8 sps:$4 sm:$0xff]   ;;  %v3790_v53 = vld [vmem:[#allocation5 + $0x7f0] ss:$8 sps:$4 sm:$0xff]  }
  0xeb   :  { %v3795_v52 = vld [vmem:[#allocation5 + $0x6e4] ss:$8 sps:$4 sm:$0xff]  }
  0xec   :  { %2327 = vmatpush1.bf16.msra.mxu0 %v3661_v7  ;;  %v3739_v7 = vld [vmem:[#allocation5 + $0x674] ss:$8 sps:$4 sm:$0xff]  }
  0xed   :  { %2328 = vmatprep.subr.bf16.mxu0 %v3669_v9  ;;  %2368 = vmatpush1.bf16.msra.mxu1 %v3664_v10  ;;  %v3730_v9 = vld [vmem:[#allocation5 + $0x580] ss:$8 sps:$4 sm:$0xff]   ;;  %v300_v10 = vcombine.high %v282_v61, %v296_v63  ;;  %v3804_v61 = vld [vmem:[#allocation5 + $0x7d4] ss:$8 sps:$4 sm:$0xff]   ;;  %v3799_v63 = vld [vmem:[#allocation5 + $0x6d0] ss:$8 sps:$4 sm:$0xff]  }
  0xee   :  { %2369 = vmatprep.subr.bf16.mxu1 %v3672_v11  ;;  %v363_v11 = vpack.c.bf16 %v261_v3, %v261_v3  ;;  %v3810_v3 = vld [vmem:[#allocation5 + $0x7c4] ss:$8 sps:$4 sm:$0xff]  }
  0xf0   :  { %2329 = vmatpush1.bf16.msra.mxu0 %v3667_v12  ;;  %v3744_v12 = vld [vmem:[#allocation5 + $0x774] ss:$8 sps:$4 sm:$0xff]  }
  0xf1   :  { %2330 = vmatprep.subr.bf16.mxu0 %v3675_v13  ;;  %2370 = vmatpush1.bf16.msra.mxu1 %v3670_v14  ;;  %v3737_v13 = vld [vmem:[#allocation5 + $0x670] ss:$8 sps:$4 sm:$0xff]   ;;  %v368_v14 = vpack.c.bf16 %v298_v6, %v298_v6  ;;  %v3813_v6 = vld [vmem:[#allocation5 + $0x6b4] ss:$8 sps:$4 sm:$0xff]  }
  0xf2   :  { %2371 = vmatprep.subr.bf16.mxu1 %v3678_v15  ;;  %v3742_v15 = vld [vmem:[#allocation5 + $0x770] ss:$8 sps:$4 sm:$0xff]  }
  0xf4   :  { %2331 = vmatpush1.bf16.msra.mxu0 %v3673_v16  ;;  %v370_v16 = vpack.c.bf16 %v300_v10, %v300_v10  ;;  %v3819_v10 = vld [vmem:[#allocation5 + $0x6a4] ss:$8 sps:$4 sm:$0xff]  }
  0xf5   :  { %2332 = vmatprep.subr.bf16.mxu0 %v3681_v17  ;;  %2372 = vmatpush1.bf16.msra.mxu1 %v3676_v18  ;;  %v3750_v17 = vld [vmem:[#allocation5 + $0x764] ss:$8 sps:$4 sm:$0xff]   ;;  %v3748_v18 = vld [vmem:[#allocation5 + $0x760] ss:$8 sps:$4 sm:$0xff]  }
  0xf6   :  { %2373 = vmatprep.subr.bf16.mxu1 %v3684_v19  ;;  %v3756_v19 = vld [vmem:[#allocation5 + $0x754] ss:$8 sps:$4 sm:$0xff]  }
  0xf8   :  { %2333 = vmatpush1.bf16.msra.mxu0 %v3679_v20  ;;  %v3751_v20 = vld [vmem:[#allocation5 + $0x650] ss:$8 sps:$4 sm:$0xff]  }
  0xf9   :  { %2334 = vmatprep.subr.bf16.mxu0 %v3687_v21  ;;  %2374 = vmatpush1.bf16.msra.mxu1 %v3682_v22  ;;  %v3759_v21 = vld [vmem:[#allocation5 + $0x644] ss:$8 sps:$4 sm:$0xff]   ;;  %v3754_v22 = vld [vmem:[#allocation5 + $0x750] ss:$8 sps:$4 sm:$0xff]  }
  0xfa   :  { %2375 = vmatprep.subr.bf16.mxu1 %v3690_v23  ;;  %v3762_v23 = vld [vmem:[#allocation5 + $0x744] ss:$8 sps:$4 sm:$0xff]  }
  0xfc   :  { %2335 = vmatpush2.bf16.msra.mxu0 %v3685_v24  ;;  %v3757_v24 = vld [vmem:[#allocation5 + $0x640] ss:$8 sps:$4 sm:$0xff]  }
  0xfd   :  { %2336 = vmatprep.subr.bf16.mxu0 %v3693_v25  ;;  %2376 = vmatpush2.bf16.msra.mxu1 %v3688_v26  ;;  %v3765_v25 = vld [vmem:[#allocation5 + $0x634] ss:$8 sps:$4 sm:$0xff]   ;;  %v3760_v26 = vld [vmem:[#allocation5 + $0x740] ss:$8 sps:$4 sm:$0xff]  }
  0xfe   :  { %2377 = vmatprep.subr.bf16.mxu1 %v3696_v27  ;;  %v3763_v27 = vld [vmem:[#allocation5 + $0x630] ss:$8 sps:$4 sm:$0xff]  }
 0x100   :  { %2337 = vmatpush2.bf16.msra.mxu0 %v3691_v28  ;;  %v3768_v28 = vld [vmem:[#allocation5 + $0x734] ss:$8 sps:$4 sm:$0xff]  }
 0x101   :  { %2338 = vmatprep.subr.bf16.mxu0 %v3699_v29  ;;  %2378 = vmatpush2.bf16.msra.mxu1 %v3694_v30  ;;  %v3766_v29 = vld [vmem:[#allocation5 + $0x730] ss:$8 sps:$4 sm:$0xff]   ;;  %v3771_v30 = vld [vmem:[#allocation5 + $0x624] ss:$8 sps:$4 sm:$0xff]  }
 0x102   :  { %2379 = vmatprep.subr.bf16.mxu1 %v3702_v31  ;;  %v3769_v31 = vld [vmem:[#allocation5 + $0x620] ss:$8 sps:$4 sm:$0xff]  }
 0x104   :  { %2339 = vmatpush2.bf16.msra.mxu0 %v3697_v32  ;;  %v3774_v32 = vld [vmem:[#allocation5 + $0x724] ss:$8 sps:$4 sm:$0xff]  }
 0x105   :  { %2340 = vmatprep.subr.bf16.mxu0 %v3705_v33  ;;  %2380 = vmatpush2.bf16.msra.mxu1 %v3700_v34  ;;  %v3902_v33 = vld [vmem:[#allocation2 + $0x20] ss:$38 sps:$4 sm:$0xff]   ;;  %v3777_v34 = vld [vmem:[#allocation5 + $0x614] ss:$8 sps:$4 sm:$0xff]  }
 0x106   :  { %2381 = vmatprep.subr.bf16.mxu1 %v3708_v35  ;;  %v3903_v35 = vld [vmem:[#allocation2 + $0x6c] ss:$38 sps:$4 sm:$0xff]  }
 0x108   :  { %2341 = vmatpush2.bf16.msra.mxu0 %v3703_v36  ;;  %v3772_v36 = vld [vmem:[#allocation5 + $0x720] ss:$8 sps:$4 sm:$0xff]  }
 0x109   :  { %2342 = vmatprep.subr.bf16.mxu0 %v3711_v37  ;;  %2382 = vmatpush2.bf16.msra.mxu1 %v3706_v38  ;;  %v4276_v37 = vrot.slane %v3902_v33, %v4221_v51  ;;  %v3780_v38 = vld [vmem:[#allocation5 + $0x714] ss:$8 sps:$4 sm:$0xff]  }
 0x10a   :  { %2383 = vmatprep.subr.bf16.mxu1 %v3714_v39  ;;  %v4279_v39 = vrot.slane %v3903_v35, %v4221_v51  ;;  %v3888_v35 = vld [vmem:[#allocation5 + $0x914] ss:$8 sps:$4 sm:$0xff]  }
 0x10c   :  { %2343 = vmatpush2.bf16.msra.mxu0 %v3709_v40  ;;  %v3775_v40 = vld [vmem:[#allocation5 + $0x610] ss:$8 sps:$4 sm:$0xff]  }
 0x10d   :  { %2344 = vmatprep.subr.bf16.mxu0 %v3717_v41  ;;  %2384 = vmatpush2.bf16.msra.mxu1 %v3712_v42  ;;  %v3783_v41 = vld [vmem:[#allocation5 + $0x604] ss:$8 sps:$4 sm:$0xff]   ;;  %v4283_v42 = vcombine.low %v4276_v37, %v4279_v39 }
 0x10e   :  { %2385 = vmatprep.subr.bf16.mxu1 %v3720_v44  ;;  %v3786_v44 = vld [vmem:[#allocation5 + $0x704] ss:$8 sps:$4 sm:$0xff]  }
 0x110   :  { %2345 = vmatpush2.bf16.msra.mxu0 %v3715_v43  ;;  %v3778_v43 = vld [vmem:[#allocation5 + $0x710] ss:$8 sps:$4 sm:$0xff]  }
 0x111   :  { %2346 = vmatprep.subr.bf16.mxu0 %v3723_v46  ;;  %2386 = vmatpush2.bf16.msra.mxu1 %v3718_v49  ;;  %v3781_v46 = vld [vmem:[#allocation5 + $0x600] ss:$8 sps:$4 sm:$0xff]   ;;  %v3792_v49 = vld [vmem:[#allocation5 + $0x7f4] ss:$8 sps:$4 sm:$0xff]  }
 0x112   :  { %2387 = vmatprep.subr.bf16.mxu1 %v3726_v50  ;;  %v3787_v50 = vld [vmem:[#allocation5 + $0x6f0] ss:$8 sps:$4 sm:$0xff]  }
 0x114   :  { %2347 = vmatpush2.bf16.msra.mxu0 %v3721_v56  ;;  %v3801_v56 = vld [vmem:[#allocation5 + $0x6d4] ss:$8 sps:$4 sm:$0xff]  }
 0x115   :  { %2348 = vmatprep.subr.bf16.mxu0 %v3729_v58  ;;  %2388 = vmatpush2.bf16.msra.mxu1 %v3724_v0  ;;  %v3796_v58 = vld [vmem:[#allocation5 + $0x7e0] ss:$8 sps:$4 sm:$0xff]   ;;  %v3807_v0 = vld [vmem:[#allocation5 + $0x6c4] ss:$8 sps:$4 sm:$0xff]  }
 0x116   :  { %2389 = vmatprep.subr.bf16.mxu1 %v3732_v2  ;;  %v3802_v2 = vld [vmem:[#allocation5 + $0x7d0] ss:$8 sps:$4 sm:$0xff]  }
 0x118   :  { %2349 = vmatpush2.bf16.msra.mxu0 %v3727_v5  ;;  %v3805_v5 = vld [vmem:[#allocation5 + $0x6c0] ss:$8 sps:$4 sm:$0xff]  }
 0x119   :  { %2400 = vmatprep.subr.bf16.mxu0 %v3739_v7  ;;  %2390 = vmatpush2.bf16.msra.mxu1 %v3730_v9  ;;  %v3808_v7 = vld [vmem:[#allocation5 + $0x7c0] ss:$8 sps:$4 sm:$0xff]   ;;  %v3811_v9 = vld [vmem:[#allocation5 + $0x6b0] ss:$8 sps:$4 sm:$0xff]  }
 0x11a   :  { %2441 = vmatprep.subr.bf16.mxu1 %v3744_v12  ;;  %v3822_v12 = vld [vmem:[#allocation5 + $0x7a4] ss:$8 sps:$4 sm:$0xff]  }
 0x11b   :  { %2351 = vmatmul.mubr.bf16.vlgmr.msra.gmra.mxu0 %v363_v11  ;;  %v3814_v11 = vld [vmem:[#allocation5 + $0x7b0] ss:$8 sps:$4 sm:$0xff]  }
 0x11c   :  { %2401 = vmatpush1.bf16.msra.mxu0 %v3737_v13  ;;  %2432 = vmatprep.mubr.bf16.mxu0 %v368_v14  ;;  %v3817_v13 = vld [vmem:[#allocation5 + $0x6a0] ss:$8 sps:$4 sm:$0xff]   ;;  %v3825_v14 = vld [vmem:[#allocation5 + $0x694] ss:$8 sps:$4 sm:$0xff]  }
 0x11d   :  { %2392 = vmatmul.mubr.bf16.vlgmr.msra.gmra.mxu1 %v365_v57  ;;  %2402 = vmatprep.subr.bf16.mxu0 %v3747_v59  ;;  %v3820_v57 = vld [vmem:[#allocation5 + $0x7a0] ss:$8 sps:$4 sm:$0xff]   ;;  %v3828_v59 = vld [vmem:[#allocation5 + $0x794] ss:$8 sps:$4 sm:$0xff]  }
 0x11e   :  { %2442 = vmatpush1.bf16.msra.mxu1 %v3742_v15  ;;  %2473 = vmatprep.mubr.bf16.mxu1 %v370_v16  ;;  %v3823_v15 = vld [vmem:[#allocation5 + $0x690] ss:$8 sps:$4 sm:$0xff]   ;;  %v3831_v16 = vld [vmem:[#allocation5 + $0x684] ss:$8 sps:$4 sm:$0xff]  }
 0x11f   :  { %2443 = vmatprep.subr.bf16.mxu1 %v3750_v17  ;;  %v3826_v17 = vld [vmem:[#allocation5 + $0x790] ss:$8 sps:$4 sm:$0xff]  }
 0x120   :  { %2403 = vmatpush1.bf16.msra.mxu0 %v3745_v62  ;;  %v3834_v62 = vld [vmem:[#allocation5 + $0x784] ss:$8 sps:$4 sm:$0xff]  }
 0x121   :  { %2404 = vmatprep.subr.bf16.mxu0 %v3753_v1  ;;  %v3829_v1 = vld [vmem:[#allocation5 + $0x680] ss:$8 sps:$4 sm:$0xff]  }
 0x122   :  { %2444 = vmatpush1.bf16.msra.mxu1 %v3748_v18  ;;  %v672_v18 = vsub.s32 0, %v4218_v45 }
 0x123   :  { %2445 = vmatprep.subr.bf16.mxu1 %v3756_v19  ;;  %v334_v19 = vcombine.high %v4276_v37, %v4279_v39  ;;  %v3844_v37 = vld [vmem:[#allocation5 + $0x860] ss:$8 sps:$4 sm:$0xff]  }
 0x124   :  { %2405 = vmatpush1.bf16.msra.mxu0 %v3751_v20  ;;  %v668_v20 = vld [vmem:[#allocation7] sm:$0x3] }
 0x125   :  { %2406 = vmatprep.subr.bf16.mxu0 %v3759_v21  ;;  %v3841_v21 = vld [vmem:[#allocation5 + $0x874] ss:$8 sps:$4 sm:$0xff]  }
 0x126   :  { %2446 = vmatpush1.bf16.msra.mxu1 %v3754_v22  ;;  %v3832_v22 = vld [vmem:[#allocation5 + $0x780] ss:$8 sps:$4 sm:$0xff]  }
 0x127   :  { %2447 = vmatprep.subr.bf16.mxu1 %v3762_v23  ;;  %v676_v23 = vsub.s32 1, %v4218_v45 }
 0x128   :  { %2407 = vmatpush1.bf16.msra.mxu0 %v3757_v24  ;;  %v367_v24 = vpack.c.bf16 %v4265_v60, %v4265_v60 }
 0x129   :  { %2408 = vmatprep.subr.bf16.mxu0 %v3765_v25  ;;  %v3882_v25 = vld [vmem:[#allocation5 + $0x924] ss:$8 sps:$4 sm:$0xff]   ;;  %v677_v33 = vrot.slane %v668_v20, %v676_v23 }
 0x12a   :  { %2448 = vmatpush1.bf16.msra.mxu1 %v3760_v26  ;;  %v673_v26 = vrot.slane %v668_v20, %v672_v18  ;;  %v3891_v20 = vld [vmem:[#allocation5 + $0x894] ss:$8 sps:$4 sm:$0xff]  }
 0x12b   :  { %2449 = vmatprep.subr.bf16.mxu1 %v3768_v28  ;;  %v3846_v28 = vld [vmem:[#allocation5 + $0x864] ss:$8 sps:$4 sm:$0xff]  }
 0x12c   :  { %2409 = vmatpush1.bf16.msra.mxu0 %v3763_v27  ;;  %v3839_v27 = vld [vmem:[#allocation5 + $0x870] ss:$8 sps:$4 sm:$0xff]  }
 0x12d   :  { %2410 = vmatprep.subr.bf16.mxu0 %v3771_v30  ;;  %v369_v30 = vpack.c.bf16 %v4271_v4, %v4271_v4  ;;  %v3849_v4 = vld [vmem:[#allocation5 + $0x854] ss:$8 sps:$4 sm:$0xff]  }
 0x12e   :  { %2450 = vmatpush1.bf16.msra.mxu1 %v3766_v29  ;;  %v372_v29 = vpack.c.bf16 %v334_v19, %v334_v19  ;;  %v3883_v19 = vld [vmem:[#allocation5 + $0x8a0] ss:$8 sps:$4 sm:$0xff]  }
 0x12f   :  { %2451 = vmatprep.subr.bf16.mxu1 %v3774_v32  ;;  %v3900_v32 = vld [vmem:[#allocation2 + $0x70] ss:$38 sps:$4 sm:$0x33]  }
 0x130   :  { %2411 = vmatpush1.bf16.msra.mxu0 %v3769_v31  ;;  %v3898_v31 = vld [vmem:[#allocation2 + $0x24] ss:$38 sps:$4 sm:$0x33]  }
 0x131   :  { %2412 = vmatprep.subr.bf16.mxu0 %v3777_v34  ;;  %v3880_v34 = vld [vmem:[#allocation5 + $0x920] ss:$8 sps:$4 sm:$0xff]  }
 0x132   :  { %2452 = vmatpush1.bf16.msra.mxu1 %v3772_v36 }
 0x133   :  { %2453 = vmatprep.subr.bf16.mxu1 %v3780_v38 }
 0x134   :  { %2413 = vmatpush1.bf16.msra.mxu0 %v3775_v40  ;;  %v318_v40 = vrot.slane %v3898_v31, %v4221_v51 }
 0x135   :  { %2414 = vmatprep.subr.bf16.mxu0 %v3783_v41  ;;  %v332_v41 = vrot.slane %v3900_v32, %v4221_v51 }
 0x136   :  { %2454 = vmatpush1.bf16.msra.mxu1 %v3778_v43 }
 0x137   :  { %2455 = vmatprep.subr.bf16.mxu1 %v3786_v44  ;;  %v335_v51 = vcombine.low %v318_v40, %v332_v41  ;;  %v3910_v40 = vld [vmem:[#allocation8 + $0x50] ss:$8 sps:$4 sm:$0xff]   ;;  %v3915_v41 = vld [vmem:[#allocation8 + $0x44] ss:$8 sps:$4 sm:$0xff]  }
 0x138   :  { %2415 = vmatpush1.bf16.msra.mxu0 %v3781_v46  ;;  %v3886_v46 = vld [vmem:[#allocation5 + $0x910] ss:$8 sps:$4 sm:$0xff]  }
 0x139   :  { %2416 = vmatprep.subr.bf16.mxu0 %v3789_v47  ;;  %v4152_v47 = vmov 0  }
 0x13a   :  { %2456 = vmatpush1.bf16.msra.mxu1 %v3784_v48 }
 0x13b   :  { %2457 = vmatprep.subr.bf16.mxu1 %v3792_v49 }
 0x13c   :  { %2417 = vmatpush2.bf16.msra.mxu0 %v3787_v50  ;;  %v3894_v50 = vld [vmem:[#allocation5 + $0x904] ss:$8 sps:$4 sm:$0xff]  }
 0x13d   :  { %2418 = vmatprep.subr.bf16.mxu0 %v3795_v52 }
 0x13e   :  { %2458 = vmatpush2.bf16.msra.mxu1 %v3790_v53  ;;  %v3847_v53 = vld [vmem:[#allocation5 + $0x850] ss:$8 sps:$4 sm:$0xff]  }
 0x13f   :  { %2459 = vmatprep.subr.bf16.mxu1 %v3798_v54 }
 0x140   :  { %2419 = vmatpush2.bf16.msra.mxu0 %v3793_v55  ;;  %v3852_v55 = vld [vmem:[#allocation5 + $0x844] ss:$8 sps:$4 sm:$0xff]  }
 0x141   :  { %2420 = vmatprep.subr.bf16.mxu0 %v3801_v56 }
 0x142   :  { %2460 = vmatpush2.bf16.msra.mxu1 %v3796_v58  ;;  %v3892_v58 = vld [vmem:[#allocation5 + $0x900] ss:$8 sps:$4 sm:$0xff]  }
 0x143   :  { %2461 = vmatprep.subr.bf16.mxu1 %v3804_v61 }
 0x144   :  { %2421 = vmatpush2.bf16.msra.mxu0 %v3799_v63  ;;  %v3850_v63 = vld [vmem:[#allocation5 + $0x840] ss:$8 sps:$4 sm:$0xff]  }
 0x145   :  { %2422 = vmatprep.subr.bf16.mxu0 %v3807_v0  ;;  %v3855_v0 = vld [vmem:[#allocation5 + $0x834] ss:$8 sps:$4 sm:$0xff]  }
 0x146   :  { %2462 = vmatpush2.bf16.msra.mxu1 %v3802_v2  ;;  %v373_v2 = vpack.c.bf16 %v335_v51, %v335_v51  ;;  %v3931_v51 = vld [vmem:[#allocation8 + $0xe0] ss:$8 sps:$4 sm:$0xff]  }
 0x147   :  { %2463 = vmatprep.subr.bf16.mxu1 %v3810_v3  ;;  %v3853_v3 = vld [vmem:[#allocation5 + $0x830] ss:$8 sps:$4 sm:$0xff]  }
 0x148   :  { %2423 = vmatpush2.bf16.msra.mxu0 %v3805_v5  ;;  %v3858_v5 = vld [vmem:[#allocation5 + $0x824] ss:$8 sps:$4 sm:$0xff]  }
 0x149   :  { %2424 = vmatprep.subr.bf16.mxu0 %v3813_v6  ;;  %v3856_v6 = vld [vmem:[#allocation5 + $0x820] ss:$8 sps:$4 sm:$0xff]  }
 0x14a   :  { %2464 = vmatpush2.bf16.msra.mxu1 %v3808_v7  ;;  %v3861_v7 = vld [vmem:[#allocation5 + $0x814] ss:$8 sps:$4 sm:$0xff]  }
 0x14b   :  { %2465 = vmatprep.subr.bf16.mxu1 %v3816_v8  ;;  %v3859_v8 = vld [vmem:[#allocation5 + $0x810] ss:$8 sps:$4 sm:$0xff]  }
 0x14c   :  { %2425 = vmatpush2.bf16.msra.mxu0 %v3811_v9  ;;  %v3864_v9 = vld [vmem:[#allocation5 + $0x804] ss:$8 sps:$4 sm:$0xff]  }
 0x14d   :  { %2426 = vmatprep.subr.bf16.mxu0 %v3819_v10  ;;  %v3862_v10 = vld [vmem:[#allocation5 + $0x800] ss:$8 sps:$4 sm:$0xff]  }
 0x14e   :  { %2466 = vmatpush2.bf16.msra.mxu1 %v3814_v11  ;;  %v3867_v11 = vld [vmem:[#allocation5 + $0x8f4] ss:$8 sps:$4 sm:$0xff]  }
 0x14f   :  { %2467 = vmatprep.subr.bf16.mxu1 %v3822_v12  ;;  %v3865_v12 = vld [vmem:[#allocation5 + $0x8f0] ss:$8 sps:$4 sm:$0xff]  }
 0x150   :  { %2427 = vmatpush2.bf16.msra.mxu0 %v3817_v13  ;;  %v3870_v13 = vld [vmem:[#allocation5 + $0x8e4] ss:$8 sps:$4 sm:$0xff]  }
 0x151   :  { %2428 = vmatprep.subr.bf16.mxu0 %v3825_v14  ;;  %v3868_v14 = vld [vmem:[#allocation5 + $0x8e0] ss:$8 sps:$4 sm:$0xff]  }
 0x152   :  { %2468 = vmatpush2.bf16.msra.mxu1 %v3820_v57  ;;  %v3873_v57 = vld [vmem:[#allocation5 + $0x8d4] ss:$8 sps:$4 sm:$0xff]  }
 0x153   :  { %2469 = vmatprep.subr.bf16.mxu1 %v3828_v59  ;;  %v3871_v59 = vld [vmem:[#allocation5 + $0x8d0] ss:$8 sps:$4 sm:$0xff]  }
 0x154   :  { %2429 = vmatpush2.bf16.msra.mxu0 %v3823_v15  ;;  %v3876_v15 = vld [vmem:[#allocation5 + $0x8c4] ss:$8 sps:$4 sm:$0xff]  }
 0x155   :  { %2430 = vmatprep.subr.bf16.mxu0 %v3831_v16  ;;  %v3874_v16 = vld [vmem:[#allocation5 + $0x8c0] ss:$8 sps:$4 sm:$0xff]  }
 0x156   :  { %2470 = vmatpush2.bf16.msra.mxu1 %v3826_v17  ;;  %v3879_v17 = vld [vmem:[#allocation5 + $0x8b4] ss:$8 sps:$4 sm:$0xff]  }
 0x157   :  { %2471 = vmatprep.subr.bf16.mxu1 %v3834_v62  ;;  %v3877_v62 = vld [vmem:[#allocation5 + $0x8b0] ss:$8 sps:$4 sm:$0xff]  }
 0x158   :  { %2431 = vmatpush2.bf16.msra.mxu0 %v3829_v1  ;;  %v3885_v1 = vld [vmem:[#allocation5 + $0x8a4] ss:$8 sps:$4 sm:$0xff]  }
 0x159   :  { %2482 = vmatprep.subr.bf16.mxu0 %v3841_v21  ;;  %v3889_v21 = vld [vmem:[#allocation5 + $0x890] ss:$8 sps:$4 sm:$0xff]  }
 0x15a   :  { %2472 = vmatpush2.bf16.msra.mxu1 %v3832_v22  ;;  %v3897_v22 = vld [vmem:[#allocation5 + $0x884] ss:$8 sps:$4 sm:$0xff]  }
 0x15b   :  { %v2188_v60 = vpop.f32.mrf.mxu0  ;;  %2433 = vmatmul.mubr.bf16.vlgmr.msra.gmra.mxu0 %v367_v24  ;;  %2533 = vmatprep.subr.bf16.mxu1 %v3882_v25  ;;  %v3895_v24 = vld [vmem:[#allocation5 + $0x880] ss:$8 sps:$4 sm:$0xff]   ;;  %v371_v25 = vpack.c.bf16 %v4283_v42, %v4283_v42 }
 0x15c   :  { %v2189_v36 = vadd.f32 %v2188_v60, %v673_v26  ;;  %2483 = vmatpush1.bf16.msra.mxu0 %v3839_v27  ;;  %2514 = vmatprep.mubr.bf16.mxu0 %v372_v29  ;;  %v2229_v39 = vpop.f32.mrf.mxu1  ;;  %v3909_v42 = vld [vmem:[#allocation8 + $0x64] ss:$8 sps:$4 sm:$0xff]  }
 0x15d   :  { %v2190_v38 = vpop.f32.mrf.mxu0  ;;  %2474 = vmatmul.mubr.bf16.vlgmr.msra.gmra.mxu1 %v369_v30  ;;  %2484 = vmatprep.subr.bf16.mxu0 %v3846_v28 }
 0x15e   :  { %v2191_v43 = vadd.f32 %v2190_v38, %v677_v33  ;;  %v4299_v44 = vadd.f32 %v2229_v39, %v2189_v36  ;;  %2534 = vmatpush1.bf16.msra.mxu1 %v3880_v34  ;;  %2555 = vmatprep.mubr.bf16.mxu1 %v4152_v47  ;;  %v2231_v49 = vpop.f32.mrf.mxu1  ;;  %v3904_v36 = vld [vmem:[#allocation8 + $0x70] ss:$8 sps:$4 sm:$0xff]   ;;  %v3907_v39 = vld [vmem:[#allocation8 + $0x60] ss:$8 sps:$4 sm:$0xff]   ;;  %v3921_v47 = vld [vmem:[#allocation8 + $0x24] ss:$8 sps:$4 sm:$0xff]  }
 0x15f   :  { %v2192_v48 = vpop.f32.mrf.mxu0  ;;  %2535 = vmatprep.subr.bf16.mxu1 %v3888_v35 }
 0x160   :  { %v4301_v52 = vadd.f32 %v2231_v49, %v2191_v43  ;;  %2485 = vmatpush1.bf16.msra.mxu0 %v3844_v37  ;;  %v2233_v56 = vpop.f32.mrf.mxu1  ;;  %v3906_v37 = vld [vmem:[#allocation8 + $0x74] ss:$8 sps:$4 sm:$0xff]   ;;  %v3913_v43 = vld [vmem:[#allocation8 + $0x40] ss:$8 sps:$4 sm:$0xff]  }
 0x161   :  { %v2193_v54 = vpop.f32.mrf.mxu0  ;;  %2486 = vmatprep.subr.bf16.mxu0 %v3849_v4  ;;  %v3912_v4 = vld [vmem:[#allocation8 + $0x54] ss:$8 sps:$4 sm:$0xff]   ;;  %v3919_v48 = vld [vmem:[#allocation8 + $0x20] ss:$8 sps:$4 sm:$0xff]   ;;  %v3933_v56 = vld [vmem:[#allocation8 + $0xe4] ss:$8 sps:$4 sm:$0xff]  }
 0x162   :  { %2536 = vmatpush1.bf16.msra.mxu1 %v3886_v46  ;;  %v2234_v61 = vpop.f32.mrf.mxu1  ;;  %v3916_v46 = vld [vmem:[#allocation8 + $0x30] ss:$8 sps:$4 sm:$0xff]   ;;  %v3924_v49 = vld [vmem:[#allocation8 + $0x14] ss:$8 sps:$4 sm:$0xff]  }
 0x163   :  { %2537 = vmatprep.subr.bf16.mxu1 %v3894_v50  ;;  %v3922_v50 = vld [vmem:[#allocation8 + $0x10] ss:$8 sps:$4 sm:$0xff]   ;;  %v3930_v54 = vld [vmem:[#allocation8 + $0xf4] ss:$8 sps:$4 sm:$0xff]  }
 0x164   :  { %2487 = vmatpush1.bf16.msra.mxu0 %v3847_v53  ;;  %v3925_v53 = vld [vmem:[#allocation8] ss:$8 sps:$4 sm:$0xff]   ;;  %v3934_v61 = vld [vmem:[#allocation8 + $0xd0] ss:$8 sps:$4 sm:$0xff]  }
 0x165   :  { %2488 = vmatprep.subr.bf16.mxu0 %v3852_v55  ;;  %v3928_v55 = vld [vmem:[#allocation8 + $0xf0] ss:$8 sps:$4 sm:$0xff]  }
 0x166   :  { %2538 = vmatpush1.bf16.msra.mxu1 %v3892_v58  ;;  %v3936_v58 = vld [vmem:[#allocation8 + $0xd4] ss:$8 sps:$4 sm:$0xff]  }
 0x167   :  { %2772 = vmatprep.subr.bf16.mxu1 %v3906_v37 }
 0x168   :  { %2489 = vmatpush1.bf16.msra.mxu0 %v3850_v63  ;;  %v3939_v63 = vld [vmem:[#allocation8 + $0xc4] ss:$8 sps:$4 sm:$0xff]  }
 0x169   :  { %2490 = vmatprep.subr.bf16.mxu0 %v3855_v0  ;;  %3340 = vmatmul.mubr.msk.bf16.vlgmr.msra.gmra.mxu1 %vm2150_vm0, %v373_v2  ;;  %v3937_v0 = vld [vmem:[#allocation8 + $0xc0] ss:$8 sps:$4 sm:$0xff]   ;;  %v3942_v2 = vld [vmem:[#allocation8 + $0xb4] ss:$8 sps:$4 sm:$0xff]  }
 0x16a   :  { %2773 = vmatpush1.bf16.msra.mxu1 %v3904_v36 }
 0x16b   :  { %2774 = vmatprep.subr.bf16.mxu1 %v3909_v42 }
 0x16c   :  { %2491 = vmatpush1.bf16.msra.mxu0 %v3853_v3  ;;  %v3940_v3 = vld [vmem:[#allocation8 + $0xb0] ss:$8 sps:$4 sm:$0xff]  }
 0x16d   :  { %2492 = vmatprep.subr.bf16.mxu0 %v3858_v5  ;;  %v3945_v5 = vld [vmem:[#allocation8 + $0xa4] ss:$8 sps:$4 sm:$0xff]  }
 0x16e   :  { %2775 = vmatpush1.bf16.msra.mxu1 %v3907_v39 }
 0x16f   :  { %2776 = vmatprep.subr.bf16.mxu1 %v3912_v4 }
 0x170   :  { %2493 = vmatpush1.bf16.msra.mxu0 %v3856_v6  ;;  %v3943_v6 = vld [vmem:[#allocation8 + $0xa0] ss:$8 sps:$4 sm:$0xff]  }
 0x171   :  { %2494 = vmatprep.subr.bf16.mxu0 %v3861_v7 }
 0x172   :  { %2777 = vmatpush1.bf16.msra.mxu1 %v3910_v40 }
 0x173   :  { %2778 = vmatprep.subr.bf16.mxu1 %v3915_v41 }
 0x174   :  { %2495 = vmatpush1.bf16.msra.mxu0 %v3859_v8 }
 0x175   :  { %2496 = vmatprep.subr.bf16.mxu0 %v3864_v9 }
 0x176   :  { %2779 = vmatpush1.bf16.msra.mxu1 %v3913_v43 }
 0x178   :  { %2497 = vmatpush1.bf16.msra.mxu0 %v3862_v10 }
 0x179   :  { %2498 = vmatprep.subr.bf16.mxu0 %v3867_v11  ;;  %v3948_v11 = vld [vmem:[#allocation8 + $0x94] ss:$8 sps:$4 sm:$0xff]  }
 0x17c   :  { %2499 = vmatpush2.bf16.msra.mxu0 %v3865_v12 }
 0x17d   :  { %2500 = vmatprep.subr.bf16.mxu0 %v3870_v13 }
 0x180   :  { %2501 = vmatpush2.bf16.msra.mxu0 %v3868_v14  ;;  %v3946_v14 = vld [vmem:[#allocation8 + $0x90] ss:$8 sps:$4 sm:$0xff]  }
 0x181   :  { %2502 = vmatprep.subr.bf16.mxu0 %v3873_v57 }
 0x184   :  { %2503 = vmatpush2.bf16.msra.mxu0 %v3871_v59 }
 0x185   :  { %2504 = vmatprep.subr.bf16.mxu0 %v3876_v15 }
 0x188   :  { %2505 = vmatpush2.bf16.msra.mxu0 %v3874_v16 }
 0x189   :  { %2506 = vmatprep.subr.bf16.mxu0 %v3879_v17 }
 0x18c   :  { %2507 = vmatpush2.bf16.msra.mxu0 %v3877_v62  ;;  %v3951_v62 = vld [vmem:[#allocation8 + $0x84] ss:$8 sps:$4 sm:$0xff]  }
 0x18d   :  { %2508 = vmatprep.subr.bf16.mxu0 %v3885_v1  ;;  %v3949_v1 = vld [vmem:[#allocation8 + $0x80] ss:$8 sps:$4 sm:$0xff]  }
 0x190   :  { %2509 = vmatpush2.bf16.msra.mxu0 %v3883_v19 }
 0x191   :  { %2510 = vmatprep.subr.bf16.mxu0 %v3891_v20  ;;  %v3952_v20 = vld [vmem:[#allocation11 + $0x78] sm:$0xff]  }
 0x194   :  { %2511 = vmatpush2.bf16.msra.mxu0 %v3889_v21  ;;  %v3953_v21 = vld [vmem:[#allocation11 + $0x38] sm:$0xff]  }
 0x195   :  { %2512 = vmatprep.subr.bf16.mxu0 %v3897_v22  ;;  %v3954_v22 = vld [vmem:[#allocation11 + $0x70] sm:$0xff]  }
 0x198   :  { %2513 = vmatpush2.bf16.msra.mxu0 %v3895_v24  ;;  %v3955_v24 = vld [vmem:[#allocation11 + $0x30] sm:$0xff]  }
 0x199   :  { %3392 = vmatprep.subr.bf16.mxu0 %v3952_v20 }
 0x19b   :  { %v2270_v26 = vpop.f32.mrf.mxu0  ;;  %2515 = vmatmul.mubr.bf16.vlgmr.msra.gmra.mxu0 %v371_v25  ;;  %v3956_v25 = vld [vmem:[#allocation11 + $0x68] sm:$0xff]  }
 0x19c   :  { %v2271_v27 = vadd.f32 %v2270_v26, %v4299_v44  ;;  %v2311_v29 = vpop.f32.mrf.mxu1  ;;  %v3918_v44 = vld [vmem:[#allocation8 + $0x34] ss:$8 sps:$4 sm:$0xff]   ;;  %3393 = vmatpush3.bf16.msra.mxu0 %v3953_v21  ;;  %v3957_v26 = vld [vmem:[#allocation11 + $0x28] sm:$0xff]  }
 0x19d   :  { %v2272_v28 = vpop.f32.mrf.mxu0  ;;  %2780 = vmatprep.subr.bf16.mxu1 %v3918_v44  ;;  %3394 = vmatprep.subr.bf16.mxu0 %v3954_v22 }
 0x19e   :  { %v2273_v30 = vadd.f32 %v2272_v28, %v4301_v52  ;;  %v4307_v31 = vadd.f32 %v2311_v29, %v2271_v27  ;;  %v2313_v33 = vpop.f32.mrf.mxu1  ;;  %2781 = vmatpush1.bf16.msra.mxu1 %v3916_v46  ;;  %v3927_v52 = vld [vmem:[#allocation8 + $0x4] ss:$8 sps:$4 sm:$0xff]   ;;  %v3960_v29 = vld [vmem:[#allocation11 + $0x58] sm:$0xff]  }
 0x19f   :  { %v2274_v32 = vpop.f32.mrf.mxu0  ;;  %2782 = vmatprep.subr.bf16.mxu1 %v3921_v47  ;;  %v3958_v27 = vld [vmem:[#allocation11 + $0x60] sm:$0xff]  }
 0x1a0   :  { %v4309_v34 = vadd.f32 %v2313_v33, %v2273_v30  ;;  %v2315_v35 = vpop.f32.mrf.mxu1  ;;  %3395 = vmatpush3.bf16.msra.mxu0 %v3955_v24  ;;  %v3959_v28 = vld [vmem:[#allocation11 + $0x20] sm:$0xff]   ;;  %v3961_v30 = vld [vmem:[#allocation11 + $0x18] sm:$0xff]   ;;  %v3963_v32 = vld [vmem:[#allocation11 + $0x10] sm:$0xff]  }
 0x1a1   :  { %v2275_v60 = vpop.f32.mrf.mxu0  ;;  %3396 = vmatprep.subr.bf16.mxu0 %v3956_v25 }
 0x1a2   :  { %v2316_v38 = vpop.f32.mrf.mxu1  ;;  %2783 = vmatpush1.bf16.msra.mxu1 %v3919_v48 }
 0x1a3   :  { %2784 = vmatprep.subr.bf16.mxu1 %v3924_v49 }
 0x1a4   :  { %3397 = vmatpush3.bf16.msra.mxu0 %v3957_v26 }
 0x1a5   :  { %3398 = vmatprep.subr.bf16.mxu0 %v3958_v27 }
 0x1a6   :  { %2785 = vmatpush1.bf16.msra.mxu1 %v3922_v50 }
 0x1a7   :  { %2786 = vmatprep.subr.bf16.mxu1 %v3927_v52 }
 0x1a8   :  { %3399 = vmatpush3.bf16.msra.mxu0 %v3959_v28 }
 0x1a9   :  { %3400 = vmatprep.subr.bf16.mxu0 %v3960_v29 }
 0x1aa   :  { %2787 = vmatpush1.bf16.msra.mxu1 %v3925_v53 }
 0x1ab   :  { %2788 = vmatprep.subr.bf16.mxu1 %v3930_v54 }
 0x1ac   :  { %3401 = vmatpush3.bf16.msra.mxu0 %v3961_v30 }
 0x1ae   :  { %2789 = vmatpush2.bf16.msra.mxu1 %v3928_v55 }
 0x1af   :  { %2790 = vmatprep.subr.bf16.mxu1 %v3933_v56 }
 0x1b2   :  { %2791 = vmatpush2.bf16.msra.mxu1 %v3931_v51 }
 0x1b3   :  { %2792 = vmatprep.subr.bf16.mxu1 %v3936_v58 }
 0x1b6   :  { %2793 = vmatpush2.bf16.msra.mxu1 %v3934_v61 }
 0x1b7   :  { %2794 = vmatprep.subr.bf16.mxu1 %v3939_v63 }
 0x1ba   :  { %2795 = vmatpush2.bf16.msra.mxu1 %v3937_v0  ;;  %v3964_v0 = vld [vmem:[#allocation11 + $0x48] sm:$0xff]  }
 0x1bb   :  { %2796 = vmatprep.subr.bf16.mxu1 %v3942_v2  ;;  %v3965_v2 = vld [vmem:[#allocation11 + $0x8] sm:$0xff]  }
 0x1be   :  { %2797 = vmatpush2.bf16.msra.mxu1 %v3940_v3  ;;  %v3966_v3 = vld [vmem:[#allocation11 + $0x40] sm:$0xff]  }
 0x1bf   :  { %2798 = vmatprep.subr.bf16.mxu1 %v3945_v5  ;;  %v3967_v5 = vld [vmem:[#allocation11] sm:$0xff]  }
 0x1c2   :  { %2799 = vmatpush2.bf16.msra.mxu1 %v3943_v6  ;;  %v2600_v6 = vld [vmem:[#allocation10] sm:$0x3] }
 0x1c3   :  { %2800 = vmatprep.subr.bf16.mxu1 %v3948_v11 }
 0x1c6   :  { %2801 = vmatpush2.bf16.msra.mxu1 %v3946_v14 }
 0x1c7   :  { %2802 = vmatprep.subr.bf16.mxu1 %v3951_v62 }
 0x1ca   :  { %2803 = vmatpush2.bf16.msra.mxu1 %v3949_v1 }
 0x1db   :  { %v2352_v7 = vpop.f32.mrf.mxu0 }
 0x1dc   :  { %v2353_v8 = vadd.f32 %v2352_v7, %v4307_v31  ;;  %v3962_v31 = vld [vmem:[#allocation11 + $0x50] sm:$0xff]   ;;  %v2605_v7 = vrot.slane %v2600_v6, %v672_v18  ;;  %v3373_v18 = vld [vmem:[#allocation13] ss:$0 sm:$0xff] }
 0x1dd   :  { %v2354_v9 = vpop.f32.mrf.mxu0  ;;  %v2393_v10 = vpop.f32.mrf.mxu1  ;;  %3402 = vmatprep.subr.bf16.mxu0 %v3962_v31 }
 0x1de   :  { %v2355_v12 = vadd.f32 %v2354_v9, %v4309_v34  ;;  %v2394_v13 = vadd.f32 %v2393_v10, %v2353_v8  ;;  %3403 = vmatpush3.bf16.msra.mxu0 %v3963_v32  ;;  %v2609_v8 = vrot.slane %v2600_v6, %v676_v23 }
 0x1df   :  { %v2356_v57 = vpop.f32.mrf.mxu0  ;;  %v2395_v59 = vpop.f32.mrf.mxu1  ;;  %3404 = vmatprep.subr.bf16.mxu0 %v3964_v0 }
 0x1e0   :  { %v2396_v15 = vadd.f32 %v2395_v59, %v2355_v12 }
 0x1e1   :  { %v2357_v16 = vpop.f32.mrf.mxu0  ;;  %v2397_v17 = vpop.f32.mrf.mxu1 }
 0x1e2   :  { %3405 = vmatpush3.bf16.msra.mxu0 %v3965_v2  ;;  %v4153_v17 = vmov 1966171168  }
 0x1e3   :  { %v2398_v19 = vpop.f32.mrf.mxu1  ;;  %3406 = vmatprep.subr.bf16.mxu0 %v3966_v3  ;;  %v2995_v62 = vunpack.c.l.s4 %v4153_v17 }
 0x1e5   :  { %v2996_v19 = vunpack.c.0.s8 %v2995_v62 }
 0x1e6   :  { %3407 = vmatpush3.bf16.msra.mxu0 %v3967_v5 }
 0x1e7   :  { %v2999_v24 = vsub.s32 %v2996_v19, %v4218_v45 }
 0x21b   :  { %v2434_v33 = vpop.f32.mrf.mxu0 }
 0x21c   :  { %v2435_v43 = vadd.f32 %v2434_v33, %v2394_v13 }
 0x21d   :  { %v2436_v34 = vpop.f32.mrf.mxu0  ;;  %v2475_v60 = vpop.f32.mrf.mxu1 }
 0x21e   :  { %v2437_v44 = vadd.f32 %v2436_v34, %v2396_v15  ;;  %v2476_v46 = vadd.f32 %v2475_v60, %v2435_v43 }
 0x21f   :  { %v2438_v35 = vpop.f32.mrf.mxu0  ;;  %v2477_v36 = vpop.f32.mrf.mxu1 }
 0x220   :  { %v2478_v48 = vadd.f32 %v2477_v36, %v2437_v44 }
 0x221   :  { %v2439_v37 = vpop.f32.mrf.mxu0  ;;  %v2479_v42 = vpop.f32.mrf.mxu1 }
 0x223   :  { %v2480_v38 = vpop.f32.mrf.mxu1 }
 0x229   :  { %v2557_v39 = vpop.f32.mrf.mxu1 }
 0x22b   :  { %v2559_v4 = vpop.f32.mrf.mxu1 }
 0x22d   :  { %v2561_v40 = vpop.f32.mrf.mxu1 }
 0x22f   :  { %v2562_v41 = vpop.f32.mrf.mxu1 }
 0x25b   :  { %v2516_v47 = vpop.f32.mrf.mxu0 }
 0x25c   :  { %v2517_v49 = vadd.f32 %v2516_v47, %v2476_v46 }
 0x25d   :  { %v2518_v50 = vpop.f32.mrf.mxu0 }
 0x25e   :  { %v2558_v52 = vadd.f32 %v2557_v39, %v2517_v49  ;;  %v2519_v53 = vadd.f32 %v2518_v50, %v2478_v48 }
 0x25f   :  { %v2520_v54 = vpop.f32.mrf.mxu0 }
 0x260   :  { %v2560_v55 = vadd.f32 %v2559_v4, %v2519_v53  ;;  %v2564_v56 = vmax.f32 %v2558_v52, 0.0 }
 0x261   :  { %v2521_v51 = vpop.f32.mrf.mxu0 }
 0x262   :  { %v2565_v58 = vmax.f32 %v2560_v55, 0.0  ;;  %v2566_v63 = vpack.c.bf16 %v2564_v56, %v2564_v56 }
 0x264   :  { %v2567_v61 = vpack.c.bf16 %v2565_v58, %v2565_v58 }
 0x266   :  { %2804 = vmatprep.mubr.bf16.mxu1 %v2567_v61 }
 0x267   :  { %2805 = vmatmul.mubr.bf16.vlgmr.msra.gmra.mxu1 %v2566_v63 }
 0x327   :  { %v2806_v9 = vpop.f32.mrf.mxu1 }
 0x328   :  { %v2807_v10 = vadd.f32 %v2806_v9, %v2605_v7 }
 0x329   :  { %v2808_v11 = vpop.f32.mrf.mxu1 }
 0x32a   :  { %v2809_v12 = vadd.f32 %v2808_v11, %v2609_v8  ;;  %v2813_v13 = vmax.f32 %v2807_v10, 0.0 }
 0x32b   :  { %v2810_v14 = vpop.f32.mrf.mxu1 }
 0x32c   :  { %v2814_v57 = vmax.f32 %v2809_v12, 0.0  ;;  %v2815_v16 = vpack.c.bf16 %v2813_v13, %v2813_v13 }
 0x32d   :  { %v2811_v59 = vpop.f32.mrf.mxu1 }
 0x32e   :  { %v2816_v15 = vpack.c.bf16 %v2814_v57, %v2814_v57 }
 0x330   :  { %2984 = vmatprep.mubr.bf16.mxu0 %v2816_v15 }
 0x331   :  { %2985 = vmatmul.mubr.bf16.vlgmr.msra.gmra.mxu0 %v2815_v16 }
 0x3f1   :  { %v3408_v1 = vpop.f32.mrf.mxu0 }
 0x3f3   :  { %v3409_v20 = vpop.f32.mrf.mxu0 }
 0x3f4   :  { %v3410_v21 = vadd.f32 %v3409_v20, %v3408_v1 }
 0x3f5   :  { %v3411_v23 = vpop.f32.mrf.mxu0 }
 0x3f6   :  { %v2987_v22 = vadd.f32 %v3410_v21, %v3373_v18 }
 0x3f7   :  { %v3412_v25 = vpop.f32.mrf.mxu0 }
 0x3f8   :  { %v2992_v26 = vpack.c.bf16 %v2987_v22, %v2987_v22 }
 0x3fa   :  { %v3000_v27 = vrot.slane %v2992_v26, %v2999_v24 }
 0x3fc   :  { %v3001_v28 = vcombine.high %v3000_v27, %v3000_v27  ;;  %v3008_v29 = vrot.slane %v3000_v27, %v2999_v24  ;;  %3390 = vst.sshfl [vmem:[#allocation14] sm:$0x1 pattern:$0x73625140] %v3000_v27 }
 0x3fe   :  { %v3015_v30 = vrot.slane %v3001_v28, %v2999_v24  ;;  %v3016_v31 = vcombine.high %v3008_v29, %v3008_v29  ;;  %3391 = vst.sshfl [vmem:[#allocation14 + $0x1] sm:$0x1 pattern:$0x73625140] %v3001_v28 }
 0x400   :  { %v3017_v32 = vcombine.high %v3015_v30, %v3015_v30  ;;  %3024 = vst [vmem:[#allocation14 + $0x2] sm:$0x1] %v3016_v31 }
 0x402   :  { %3025 = vst [vmem:[#allocation14 + $0x3] sm:$0x1] %v3017_v32 }
 0x403   :  { %3030 = vsyncadd [#allocation4], 48  ;;  %s4154_s4 = smov [#allocation14]  }
 0x404   :  { %s3031_s6 = sshll.u32 %s4154_s4, 4  ;;  %s3032_s6 = int_to_ptr.vmem [resolvable:$true] %s3031_s6 }
 0x405   :  { %s4108_s1 = scalar_lea.vmem %s3032_s6, 16  ;;  %s4112_s16 = scalar_lea.vmem %s3032_s6, 64 }
 0x406   :  { %p4109_p7 = scmp.ne.s32.totalorder %s3032_s6, %s4108_s1  ;;  %p4113_p8 = scmp.lt.s32.totalorder %s3032_s6, %s3032_s6 }
 0x407   :  { %p4114_p9 = scmp.lt.s32.totalorder %s4112_s16, %s4108_s1 }
 0x409   :  { %p4115_p10 = por %p4114_p9, %p4113_p8 }
 0x40b   :  { %p4116_p11 = pnand %p4115_p10, %p4109_p7 }
 0x40d   :  { %4119 = shalt.err (!%p4116_p11)
}
 0x40e   :  { %s4155_s17 = smov 16   ;;  %s4156_s18 = smov 1  }
 0x40f   :  { %3037 = dma.vmem_to_hbm [thread:$0]  %s3032_s6, 16, %s4328_s7, [#allocation4], %s4155_s17, %s4155_s17, %s4156_s18  }
 0x410   :  { %4136 = dma.done.wait [#allocation4], 64  }
 0x411   :  { %4137 = vsyncadd [#allocation4], 4294967232 }
 0x412   :  { %3041 = vsyncpa [#allocation3], 1 }
 0x413   :  { %3042 = vsyncpa [#allocation6], 1 }
 0x414   :  { %3043 = vsyncpa [#allocation9], 1 }
 0x415   :  { %3044 = vsyncpa [#allocation12], 1 }
 0x416   :  { %3045 = vsyncpa [#allocation4], 1 }

</bundles_post_ra>
